<compile_context>
chip_gen: v5e
topology: v5e:2x2
jax: 0.10.0
libtpu: 0.0.40
codegen_flags: <defaults>
</compile_context>

<pallas_src>
import functools

import jax
import jax.numpy as jnp
from jax.experimental import pallas as pl
from jax.experimental.pallas import tpu as pltpu


# --------------------------- chip-dependent tiling ---------------------------

def _vmem_capacity_bytes():
    try:
        info = pltpu.get_tpu_info()
        for attr in ("vmem_capacity_bytes", "vmem_size_bytes", "vmem_bytes"):
            v = getattr(info, attr, None)
            if v:
                return int(v)
    except Exception:
        pass
    return 64 * 1024 * 1024  # conservative default == v7x


def _select_config():
    vmem = _vmem_capacity_bytes()
    if vmem >= 96 * 1024 * 1024:
        # v5e / v6e: 128 MiB physical VMEM -> big row tiles, 96 MiB scoped.
        return dict(vmem_limit=96 * 1024 * 1024, tm=512, tq=512, tk=256,
                    ti_max=1024)
    # v7x: 64 MiB physical VMEM -> conservative tiles, 48 MiB scoped.
    return dict(vmem_limit=48 * 1024 * 1024, tm=256, tq=256, tk=128,
                ti_max=512)


_CFG = _select_config()
_I_PAD = 512  # MLP intermediate dim padded to a multiple of this at init.


def _cp(semantics):
    return pltpu.CompilerParams(dimension_semantics=semantics,
                                vmem_limit_bytes=_CFG['vmem_limit'])


def _round_up(x, m):
    return (x + m - 1) // m * m


def _probe_buffered_kwargs():
    """Probe once whether pipeline_mode=pl.Buffered(1) is supported, so the
    grid-invariant weight operands can be single-buffered (VMEM savings,
    mainly on v7x).  Falls back to default double-buffering otherwise."""
    if not hasattr(pl, "Buffered"):
        return {}
    kwargs = {"pipeline_mode": pl.Buffered(1)}
    try:
        def _copy_kernel(x_ref, o_ref):
            o_ref[...] = x_ref[...] + 1.0

        spec = pl.BlockSpec((8, 128), lambda i: (0, 0), **kwargs)
        fn = pl.pallas_call(
            _copy_kernel,
            grid=(2,),
            in_specs=[spec],
            out_specs=pl.BlockSpec((8, 128), lambda i: (0, 0)),
            out_shape=jax.ShapeDtypeStruct((8, 128), jnp.float32),
        )
        jax.block_until_ready(jax.jit(fn)(jnp.zeros((8, 128), jnp.float32)))
        return kwargs
    except Exception:
        return {}


_WEIGHT_PIPELINE = _probe_buffered_kwargs()


def _const_spec(shape):
    """BlockSpec for a grid-invariant (weight) operand; single-buffered when
    the running JAX supports pipeline_mode."""
    return pl.BlockSpec(shape, lambda *_: (0,) * len(shape), **_WEIGHT_PIPELINE)


# ------------------------------- Pallas kernels -------------------------------

def _patch_embed_kernel(x_ref, w_ref, b_ref, pos_ref, o_ref):
    # x: (1, tp, K) bf16   w: (K, D) bf16   b: (1, D) f32   pos: (tp, D) f32
    acc = jnp.dot(x_ref[0], w_ref[...], preferred_element_type=jnp.float32)
    o_ref[0] = (acc + b_ref[...] + pos_ref[...]).astype(o_ref.dtype)


def _ln_qkv_kernel(x_ref, g_ref, b_ref, w_ref, bias_ref, q_ref, k_ref, v_ref,
                   *, eps):
    # Fused LayerNorm1 + combined QKV projection.
    # x: (tm, D) bf16   w: (D, 3D) bf16   bias: (1, 3D) f32
    x = x_ref[...].astype(jnp.float32)
    mu = jnp.mean(x, axis=-1, keepdims=True)
    var = jnp.mean(jnp.square(x - mu), axis=-1, keepdims=True)
    y = ((x - mu) * jax.lax.rsqrt(var + eps) * g_ref[...]
         + b_ref[...]).astype(jnp.bfloat16)
    acc = jnp.dot(y, w_ref[...], preferred_element_type=jnp.float32)
    acc = acc + bias_ref[...]
    d = q_ref.shape[-1]
    q_ref[...] = acc[:, 0 * d:1 * d].astype(q_ref.dtype)
    k_ref[...] = acc[:, 1 * d:2 * d].astype(k_ref.dtype)
    v_ref[...] = acc[:, 2 * d:3 * d].astype(v_ref.dtype)


def _flash_attn_out_kernel(q_ref, k_ref, v_ref, ow_ref, ob_ref, r_ref, o_ref,
                           q_sc, m_sc, l_sc, acc_sc,
                           *, scale, num_heads, seq_len):
    # Flash-attention over kv tiles with online softmax; the attention output
    # projection + residual add is fused into the finalize step.
    # q: (1, tq, D) bf16   k/v: (1, tk, D) bf16   ow: (D, D) bf16
    j = pl.program_id(2)
    tq, d_model = q_ref.shape[1], q_ref.shape[2]
    tk = k_ref.shape[1]
    dh = d_model // num_heads

    @pl.when(j == 0)
    def _():
        m_sc[...] = jnp.full_like(m_sc, -jnp.inf)
        l_sc[...] = jnp.zeros_like(l_sc)
        acc_sc[...] = jnp.zeros_like(acc_sc)
        # Head split of q is constant along the kv axis -> do it once.
        q_sc[...] = jnp.transpose(q_ref[0].reshape(tq, num_heads, dh),
                                  (1, 0, 2))

    # Masking only when the kv tiling actually pads the sequence (static).
    needs_mask = (seq_len % tk) != 0

    k = jnp.transpose(k_ref[0].reshape(tk, num_heads, dh), (1, 0, 2))
    if needs_mask:
        # Zero padded V rows (garbage/NaN would poison the PV matmul).
        row_valid = (jax.lax.broadcasted_iota(jnp.int32, (tk, 1), 0)
                     + j * tk < seq_len)
        v_in = jnp.where(row_valid, v_ref[0], 0)
    else:
        v_in = v_ref[0]
    v = jnp.transpose(v_in.reshape(tk, num_heads, dh), (1, 0, 2))

    s = jnp.einsum('hqd,hkd->hqk', q_sc[...], k,
                   preferred_element_type=jnp.float32) * scale
    if needs_mask:
        col_valid = (jax.lax.broadcasted_iota(jnp.int32, (1, 1, tk), 2)
                     + j * tk < seq_len)
        s = jnp.where(col_valid, s, -jnp.inf)

    m_prev = m_sc[...]
    m_new = jnp.maximum(m_prev, jnp.max(s, axis=-1, keepdims=True))
    alpha = jnp.exp(m_prev - m_new)
    p = jnp.exp(s - m_new)
    l_sc[...] = alpha * l_sc[...] + jnp.sum(p, axis=-1, keepdims=True)
    acc_sc[...] = alpha * acc_sc[...] + jnp.einsum(
        'hqk,hkd->hqd', p.astype(jnp.bfloat16), v,
        preferred_element_type=jnp.float32)
    m_sc[...] = m_new

    # NOTE: attention_dropout = 0.0 -> dropout is a no-op and is skipped.
    @pl.when(j == pl.num_programs(2) - 1)
    def _():
        attn = acc_sc[...] * pl.reciprocal(l_sc[...], approx=True)  # (H,tq,dh)
        attn = jnp.transpose(attn, (1, 0, 2)).reshape(tq, d_model)
        out = jnp.dot(attn.astype(jnp.bfloat16), ow_ref[...],
                      preferred_element_type=jnp.float32)
        o_ref[0] = (r_ref[0].astype(jnp.float32) + out
                    + ob_ref[...]).astype(o_ref.dtype)


def _ln_mlp_kernel(h_ref, g_ref, b_ref, w1_ref, b1_ref, w2_ref, b2_ref, o_ref,
                   y_sc, acc_sc, *, eps):
    # Fused LayerNorm2 + fc1 + gelu_tanh + fc2 + residual, tiled over the
    # (padded) intermediate dim I (grid axis 1) with a VMEM f32 accumulator.
    it = pl.program_id(1)

    @pl.when(it == 0)
    def _():
        h = h_ref[...].astype(jnp.float32)
        mu = jnp.mean(h, axis=-1, keepdims=True)
        var = jnp.mean(jnp.square(h - mu), axis=-1, keepdims=True)
        y_sc[...] = ((h - mu) * jax.lax.rsqrt(var + eps) * g_ref[...]
                     + b_ref[...]).astype(y_sc.dtype)
        acc_sc[...] = jnp.zeros_like(acc_sc)

    t = jnp.dot(y_sc[...], w1_ref[...],
                preferred_element_type=jnp.float32) + b1_ref[...]
    c = 0.7978845608028654  # sqrt(2/pi)
    g = 0.5 * t * (1.0 + jnp.tanh(c * (t + 0.044715 * t * t * t)))
    acc_sc[...] += jnp.dot(g.astype(jnp.bfloat16), w2_ref[...],
                           preferred_element_type=jnp.float32)

    @pl.when(it == pl.num_programs(1) - 1)
    def _():
        o_ref[...] = (h_ref[...].astype(jnp.float32) + acc_sc[...]
                      + b2_ref[...]).astype(o_ref.dtype)


def _layernorm_kernel(x_ref, g_ref, b_ref, o_ref, *, eps):
    x = x_ref[...].astype(jnp.float32)
    mu = jnp.mean(x, axis=-1, keepdims=True)
    var = jnp.mean(jnp.square(x - mu), axis=-1, keepdims=True)
    o_ref[...] = ((x - mu) * jax.lax.rsqrt(var + eps) * g_ref[...]
                  + b_ref[...]).astype(o_ref.dtype)


# ------------------------------- kernel wrappers -------------------------------

def patch_embed(patches, w, b, pos):
    # patches: (B, Np, K) bf16 (cast in the caller to halve the stem DMA)
    B, Np, K = patches.shape
    D = w.shape[1]
    tp = min(_CFG['tm'], Np)
    return pl.pallas_call(
        _patch_embed_kernel,
        grid=(B, pl.cdiv(Np, tp)),
        in_specs=[
            pl.BlockSpec((1, tp, K), lambda bb, p: (bb, p, 0)),
            _const_spec((K, D)),                      # weight, single-buffered
            pl.BlockSpec((1, D), lambda bb, p: (0, 0)),
            pl.BlockSpec((tp, D), lambda bb, p: (p, 0)),
        ],
        out_specs=pl.BlockSpec((1, tp, D), lambda bb, p: (bb, p, 0)),
        out_shape=jax.ShapeDtypeStruct((B, Np, D), jnp.bfloat16),
        compiler_params=_cp(("parallel", "parallel")),
    )(patches, w, b.reshape(1, D), pos)


def ln_qkv(x, g, b, w_qkv, b_qkv, eps):
    M, D = x.shape
    tm = min(_CFG['tm'], M)
    row = lambda i: (i, 0)
    rep = lambda i: (0, 0)
    q, k, v = pl.pallas_call(
        functools.partial(_ln_qkv_kernel, eps=eps),
        grid=(pl.cdiv(M, tm),),
        in_specs=[
            pl.BlockSpec((tm, D), row),
            pl.BlockSpec((1, D), rep),
            pl.BlockSpec((1, D), rep),
            _const_spec((D, 3 * D)),                  # weight, single-buffered
            pl.BlockSpec((1, 3 * D), rep),
        ],
        out_specs=[pl.BlockSpec((tm, D), row)] * 3,
        out_shape=[jax.ShapeDtypeStruct((M, D), jnp.bfloat16)] * 3,
        compiler_params=_cp(("parallel",)),
    )(x, g.reshape(1, D), b.reshape(1, D), w_qkv, b_qkv.reshape(1, 3 * D))
    return q, k, v


def flash_attention_outproj(q, k, v, o_w, o_b, residual, num_heads, scale):
    """Flash attention fused with the output projection + residual add."""
    B, S, D = q.shape
    tq = min(_CFG['tq'], S)
    tk = min(_CFG['tk'], S)
    dh = D // num_heads
    q_spec = pl.BlockSpec((1, tq, D), lambda bb, i, j: (bb, i, 0))
    kv_spec = pl.BlockSpec((1, tk, D), lambda bb, i, j: (bb, j, 0))
    r_spec = pl.BlockSpec((1, tq, D), lambda bb, i, j: (bb, i, 0))
    # NOTE(v7x megacore): with tiny B and few q tiles the "parallel" axes give
    # only coarse core sharding; shrink tq here if profiling shows an idle TC.
    return pl.pallas_call(
        functools.partial(_flash_attn_out_kernel, scale=scale,
                          num_heads=num_heads, seq_len=S),
        grid=(B, pl.cdiv(S, tq), pl.cdiv(S, tk)),
        in_specs=[q_spec, kv_spec, kv_spec,
                  _const_spec((D, D)),               # o_w, single-buffered
                  pl.BlockSpec((1, D), lambda bb, i, j: (0, 0)),
                  r_spec],
        out_specs=pl.BlockSpec((1, tq, D), lambda bb, i, j: (bb, i, 0)),
        out_shape=jax.ShapeDtypeStruct((B, S, D), jnp.bfloat16),
        scratch_shapes=[
            pltpu.VMEM((num_heads, tq, dh), jnp.bfloat16),   # hoisted q heads
            pltpu.VMEM((num_heads, tq, 1), jnp.float32),     # running max
            pltpu.VMEM((num_heads, tq, 1), jnp.float32),     # running sum
            pltpu.VMEM((num_heads, tq, dh), jnp.float32),    # output acc
        ],
        compiler_params=_cp(("parallel", "parallel", "arbitrary")),
    )(q, k, v, o_w, o_b.reshape(1, D), residual)


def ln_mlp(h, g, b, w1, b1, w2, b2, eps):
    M, D = h.shape
    I = w1.shape[1]
    if I > _I_PAD and I % _I_PAD != 0:
        # Fallback for unpadded weights; the weight-load path / init_params
        # should pad instead (padded I columns contribute exactly 0).
        Ip = _round_up(I, _I_PAD)
        w1 = jnp.pad(w1, ((0, 0), (0, Ip - I)))
        b1 = jnp.pad(b1, ((0, Ip - I),))
        w2 = jnp.pad(w2, ((0, Ip - I), (0, 0)))
        I = Ip
    tm = min(_CFG['tm'], M)
    if I <= _I_PAD:
        ti = I
    elif _CFG['ti_max'] >= 1024 and I % 1024 == 0:
        ti = 1024
    else:
        ti = _I_PAD
    # w1/w2 stay default double-buffered on purpose: they change along the I
    # grid axis, which is exactly the DMA pipelining of the K reduction.
    return pl.pallas_call(
        functools.partial(_ln_mlp_kernel, eps=eps),
        grid=(pl.cdiv(M, tm), I // ti),
        in_specs=[
            pl.BlockSpec((tm, D), lambda i, j: (i, 0)),
            pl.BlockSpec((1, D), lambda i, j: (0, 0)),
            pl.BlockSpec((1, D), lambda i, j: (0, 0)),
            pl.BlockSpec((D, ti), lambda i, j: (0, j)),
            pl.BlockSpec((1, ti), lambda i, j: (0, j)),
            pl.BlockSpec((ti, D), lambda i, j: (j, 0)),
            pl.BlockSpec((1, D), lambda i, j: (0, 0)),
        ],
        out_specs=pl.BlockSpec((tm, D), lambda i, j: (i, 0)),
        out_shape=jax.ShapeDtypeStruct((M, D), jnp.bfloat16),
        scratch_shapes=[pltpu.VMEM((tm, D), jnp.bfloat16),
                        pltpu.VMEM((tm, D), jnp.float32)],
        compiler_params=_cp(("parallel", "arbitrary")),
    )(h, g.reshape(1, D), b.reshape(1, D), w1, b1.reshape(1, I), w2,
      b2.reshape(1, D))


def layer_norm(x, g, b, eps, out_dtype=jnp.float32):
    M, D = x.shape
    tm = min(_CFG['tm'], M)
    row = lambda i: (i, 0)
    rep = lambda i: (0, 0)
    return pl.pallas_call(
        functools.partial(_layernorm_kernel, eps=eps),
        grid=(pl.cdiv(M, tm),),
        in_specs=[pl.BlockSpec((tm, D), row),
                  pl.BlockSpec((1, D), rep),
                  pl.BlockSpec((1, D), rep)],
        out_specs=pl.BlockSpec((tm, D), row),
        out_shape=jax.ShapeDtypeStruct((M, D), out_dtype),
        compiler_params=_cp(("parallel",)),
    )(x, g.reshape(1, D), b.reshape(1, D))


# ------------------------------- model assembly -------------------------------

def encoder_layer(h, p, cfg):
    B, S, D = h.shape
    M = B * S
    nh = cfg['num_heads']
    scale = (D // nh) ** (-0.5)
    eps = cfg['eps']

    q, k, v = ln_qkv(h.reshape(M, D), p['ln1_g'], p['ln1_b'],
                     p['qkv_w'], p['qkv_b'], eps)
    # attention + out_proj + residual (residual = pre-LN1 hidden state h)
    h = flash_attention_outproj(q.reshape(B, S, D), k.reshape(B, S, D),
                                v.reshape(B, S, D), p['o_w'], p['o_b'],
                                h, nh, scale)
    h2 = ln_mlp(h.reshape(M, D), p['ln2_g'], p['ln2_b'],
                p['fc1_w'], p['fc1_b'], p['fc2_w'], p['fc2_b'], eps)
    return h2.reshape(B, S, D)


def siglip_vision_model(pixel_values, params, cfg):
    B, C, H, W = pixel_values.shape
    P = cfg['patch_size']
    D = cfg['hidden_size']
    Hp, Wp = H // P, W // P
    Np = Hp * Wp

    # im2col: NCHW -> (B, Np, C*P*P), patch inner order (c, ph, pw) matching
    # the flattened Conv2d weight (kernel == stride -> 'valid' conv == matmul).
    x = pixel_values.reshape(B, C, Hp, P, Wp, P)
    x = jnp.transpose(x, (0, 2, 4, 1, 3, 5)).reshape(B, Np, C * P * P)
    x = x.astype(jnp.bfloat16)   # halves the stem DMA; accumulation stays f32

    h = patch_embed(x, params['patch_w'], params['patch_b'], params['pos_emb'])
    for lp in params['layers']:
        h = encoder_layer(h, lp, cfg)

    out = layer_norm(h.reshape(B * Np, D),
                     params['post_ln_g'], params['post_ln_b'], cfg['eps'])
    return out.reshape(B, Np, D)


# ------------------------------- parameter init -------------------------------

def init_params(key, cfg):
    D = cfg['hidden_size']
    I = cfg['intermediate_size']
    C = cfg['num_channels']
    P = cfg['patch_size']
    Np = (cfg['image_size'] // P) ** 2
    L = cfg['num_layers']
    # Pad the MLP intermediate dim so the I-tile in ln_mlp never falls back to
    # the full width (e.g. so400m I=4304 -> 4608).  Padded columns are zero.
    Ip = I if I <= _I_PAD else _round_up(I, _I_PAD)

    def normal(k, shape, scale=0.02, dtype=jnp.float32):
        return (scale * jax.random.normal(k, shape, dtype=jnp.float32)).astype(dtype)

    keys = jax.random.split(key, 3 + L)
    params = {
        'patch_w': normal(keys[0], (C * P * P, D), dtype=jnp.bfloat16),
        'patch_b': normal(keys[1], (D,)),
        'pos_emb': normal(keys[2], (Np, D)),
        'post_ln_g': jnp.ones((D,), jnp.float32),
        'post_ln_b': jnp.zeros((D,), jnp.float32),
        'layers': [],
    }
    for li in range(L):
        lk = jax.random.split(keys[3 + li], 12)
        q_w, k_w, v_w = (normal(lk[i], (D, D)) for i in (0, 2, 4))
        q_b, k_b, v_b = (normal(lk[i], (D,)) for i in (1, 3, 5))
        fc1_w = normal(lk[8], (D, I))
        fc1_b = normal(lk[9], (I,))
        fc2_w = normal(lk[10], (I, D))
        if Ip != I:
            fc1_w = jnp.pad(fc1_w, ((0, 0), (0, Ip - I)))
            fc1_b = jnp.pad(fc1_b, ((0, Ip - I),))
            fc2_w = jnp.pad(fc2_w, ((0, Ip - I), (0, 0)))
        params['layers'].append({
            'ln1_g': jnp.ones((D,), jnp.float32),
            'ln1_b': jnp.zeros((D,), jnp.float32),
            'qkv_w': jnp.concatenate([q_w, k_w, v_w], axis=1).astype(jnp.bfloat16),
            'qkv_b': jnp.concatenate([q_b, k_b, v_b], axis=0),
            'o_w': normal(lk[6], (D, D), dtype=jnp.bfloat16),
            'o_b': normal(lk[7], (D,)),
            'ln2_g': jnp.ones((D,), jnp.float32),
            'ln2_b': jnp.zeros((D,), jnp.float32),
            'fc1_w': fc1_w.astype(jnp.bfloat16),
            'fc1_b': fc1_b,
            'fc2_w': fc2_w.astype(jnp.bfloat16),
            'fc2_b': normal(lk[11], (D,)),
        })
    return params


# ----------------------------------- main --------------------------------------

if __name__ == "__main__":
    cfg = dict(
        hidden_size=32,
        intermediate_size=64,
        num_layers=2,
        num_heads=4,
        num_channels=3,
        image_size=16,
        patch_size=8,
        eps=1e-6,
    )
    key = jax.random.PRNGKey(0)
    pkey, xkey = jax.random.split(key)
    params = init_params(pkey, cfg)

    batch = 2
    pixel_values = jax.random.normal(
        xkey, (batch, cfg['num_channels'], cfg['image_size'], cfg['image_size']),
        dtype=jnp.float32)

    fwd = jax.jit(functools.partial(siglip_vision_model, cfg=cfg))
    out = fwd(pixel_values, params)
    jax.block_until_ready(out)

    num_patches = (cfg['image_size'] // cfg['patch_size']) ** 2
    assert out.shape == (batch, num_patches, cfg['hidden_size']), out.shape
    assert jnp.all(jnp.isfinite(out))
    print("KERNEL_OK")
</pallas_src>

<mosaic_0001>
module attributes {stable_mosaic.version = 11 : i64} {
  func.func @_copy_kernel(%arg0: i32, %arg1: memref<8x128xf32, #tpu.memory_space<vmem>>, %arg2: memref<8x128xf32, #tpu.memory_space<vmem>>) attributes {dimension_semantics = [#tpu.dimension_semantics<arbitrary>], iteration_bounds = array<i64: 2>, scalar_prefetch = 0 : i64, scratch_operands = 0 : i64, tpu.core_type = #tpu.core_type<tc>, window_params = [{pipeline_mode = #tpu.pipeline_mode<synchronous>, transform_indices = @transform_0, window_bounds = array<i64: 8, 128>}, {pipeline_mode = #tpu.pipeline_mode<synchronous>, transform_indices = @transform_1, window_bounds = array<i64: 8, 128>}]} {
    %c0 = arith.constant 0 : index
    %c0_0 = arith.constant 0 : index
    %0 = vector.load %arg1[%c0, %c0_0] : memref<8x128xf32, #tpu.memory_space<vmem>>, vector<8x128xf32>
    %cst = arith.constant 1.000000e+00 : f32
    %1 = vector.broadcast %cst : f32 to vector<8x128xf32>
    %2 = arith.addf %0, %1 : vector<8x128xf32>
    %c0_1 = arith.constant 0 : index
    %c0_2 = arith.constant 0 : index
    %3 = vector.load %arg2[%c0_1, %c0_2] : memref<8x128xf32, #tpu.memory_space<vmem>>, vector<8x128xf32>
    tpu.vector_store %arg2[%c0_1, %c0_2], %2 {strides = array<i32>} : memref<8x128xf32, #tpu.memory_space<vmem>>, vector<8x128xf32>,
    return
  }
  func.func @transform_0(%arg0: i32) -> (i32, i32) {
    %c0_i32 = arith.constant 0 : i32
    %c0_i32_0 = arith.constant 0 : i32
    %c0_i32_1 = arith.constant 0 : i32
    return %c0_i32, %c0_i32_0 : i32, i32
  }
  func.func @transform_1(%arg0: i32) -> (i32, i32) {
    %c0_i32 = arith.constant 0 : i32
    %c0_i32_0 = arith.constant 0 : i32
    %c0_i32_1 = arith.constant 0 : i32
    return %c0_i32, %c0_i32_0 : i32, i32
  }
}

module attributes {stable_mosaic.version = 11 : i64} {
  func.func @_patch_embed_kernel(%arg0: i32, %arg1: i32, %arg2: memref<1x4x192xbf16, #tpu.memory_space<vmem>>, %arg3: memref<192x32xbf16, #tpu.memory_space<vmem>>, %arg4: memref<1x32xf32, #tpu.memory_space<vmem>>, %arg5: memref<4x32xf32, #tpu.memory_space<vmem>>, %arg6: memref<1x4x32xbf16, #tpu.memory_space<vmem>>) attributes {dimension_semantics = [#tpu.dimension_semantics<parallel>, #tpu.dimension_semantics<parallel>], iteration_bounds = array<i64: 2, 1>, scalar_prefetch = 0 : i64, scratch_operands = 0 : i64, tpu.core_type = #tpu.core_type<tc>, window_params = [{transform_indices = @transform_0, window_bounds = array<i64: 1, 4, 192>}, {pipeline_mode = #tpu.pipeline_mode<synchronous>, transform_indices = @transform_1, window_bounds = array<i64: 192, 32>}, {pipeline_mode = #tpu.pipeline_mode<synchronous>, transform_indices = @transform_2, window_bounds = array<i64: 1, 32>}, {transform_indices = @transform_3, window_bounds = array<i64: 4, 32>}, {transform_indices = @transform_4, window_bounds = array<i64: 1, 4, 32>}]} {
    %c0 = arith.constant 0 : index
    %c0_0 = arith.constant 0 : index
    %c0_1 = arith.constant 0 : index
    %0 = vector.load %arg2[%c0, %c0_0, %c0_1] : memref<1x4x192xbf16, #tpu.memory_space<vmem>>, vector<1x4x192xbf16>
    %1 = vector.shape_cast %0 : vector<1x4x192xbf16> to vector<4x192xbf16>
    %c0_2 = arith.constant 0 : index
    %c0_3 = arith.constant 0 : index
    %2 = vector.load %arg3[%c0_2, %c0_3] : memref<192x32xbf16, #tpu.memory_space<vmem>>, vector<192x32xbf16>
    %cst = arith.constant dense<0.000000e+00> : vector<4x32xf32>
    %3 = tpu.matmul %1, %2, %cst {dimension_numbers = #tpu.dot_dimension_numbers<[1], [0], [0], [1], [0, 0, 1, 1], [], []>} : vector<4x192xbf16>, vector<192x32xbf16>, vector<4x32xf32> -> vector<4x32xf32>
    %c0_4 = arith.constant 0 : index
    %c0_5 = arith.constant 0 : index
    %4 = vector.load %arg4[%c0_4, %c0_5] : memref<1x32xf32, #tpu.memory_space<vmem>>, vector<1x32xf32>
    %5 = vector.broadcast %4 : vector<1x32xf32> to vector<4x32xf32>
    %6 = arith.addf %3, %5 : vector<4x32xf32>
    %c0_6 = arith.constant 0 : index
    %c0_7 = arith.constant 0 : index
    %7 = vector.load %arg5[%c0_6, %c0_7] : memref<4x32xf32, #tpu.memory_space<vmem>>, vector<4x32xf32>
    %8 = arith.addf %6, %7 : vector<4x32xf32>
    %9 = arith.truncf %8 : vector<4x32xf32> to vector<4x32xbf16>
    %c0_8 = arith.constant 0 : index
    %c0_9 = arith.constant 0 : index
    %c0_10 = arith.constant 0 : index
    %10 = vector.load %arg6[%c0_8, %c0_9, %c0_10] : memref<1x4x32xbf16, #tpu.memory_space<vmem>>, vector<1x4x32xbf16>
    %11 = vector.shape_cast %10 : vector<1x4x32xbf16> to vector<4x32xbf16>
    %12 = vector.shape_cast %9 : vector<4x32xbf16> to vector<1x4x32xbf16>
    tpu.vector_store %arg6[%c0_8, %c0_9, %c0_10], %12 {strides = array<i32>} : memref<1x4x32xbf16, #tpu.memory_space<vmem>>, vector<1x4x32xbf16>,
    return
  }
  func.func @transform_0(%arg0: i32, %arg1: i32) -> (i32, i32, i32) {
    %c0_i32 = arith.constant 0 : i32
    %c0_i32_0 = arith.constant 0 : i32
    return %arg0, %arg1, %c0_i32 : i32, i32, i32
  }
  func.func @transform_1(%arg0: i32, %arg1: i32) -> (i32, i32) {
    %c0_i32 = arith.constant 0 : i32
    %c0_i32_0 = arith.constant 0 : i32
    %c0_i32_1 = arith.constant 0 : i32
    return %c0_i32, %c0_i32_0 : i32, i32
  }
  func.func @transform_2(%arg0: i32, %arg1: i32) -> (i32, i32) {
    %c0_i32 = arith.constant 0 : i32
    %c0_i32_0 = arith.constant 0 : i32
    %c0_i32_1 = arith.constant 0 : i32
    return %c0_i32, %c0_i32_0 : i32, i32
  }
  func.func @transform_3(%arg0: i32, %arg1: i32) -> (i32, i32) {
    %c0_i32 = arith.constant 0 : i32
    %c0_i32_0 = arith.constant 0 : i32
    return %arg1, %c0_i32 : i32, i32
  }
  func.func @transform_4(%arg0: i32, %arg1: i32) -> (i32, i32, i32) {
    %c0_i32 = arith.constant 0 : i32
    %c0_i32_0 = arith.constant 0 : i32
    return %arg0, %arg1, %c0_i32 : i32, i32, i32
  }
}

module attributes {stable_mosaic.version = 11 : i64} {
  func.func @_ln_qkv_kernel(%arg0: i32, %arg1: memref<8x32xbf16, #tpu.memory_space<vmem>>, %arg2: memref<1x32xf32, #tpu.memory_space<vmem>>, %arg3: memref<1x32xf32, #tpu.memory_space<vmem>>, %arg4: memref<32x96xbf16, #tpu.memory_space<vmem>>, %arg5: memref<1x96xf32, #tpu.memory_space<vmem>>, %arg6: memref<8x32xbf16, #tpu.memory_space<vmem>>, %arg7: memref<8x32xbf16, #tpu.memory_space<vmem>>, %arg8: memref<8x32xbf16, #tpu.memory_space<vmem>>) attributes {dimension_semantics = [#tpu.dimension_semantics<parallel>], iteration_bounds = array<i64: 1>, scalar_prefetch = 0 : i64, scratch_operands = 0 : i64, tpu.core_type = #tpu.core_type<tc>, window_params = [{transform_indices = @transform_0, window_bounds = array<i64: 8, 32>}, {pipeline_mode = #tpu.pipeline_mode<synchronous>, transform_indices = @transform_1, window_bounds = array<i64: 1, 32>}, {pipeline_mode = #tpu.pipeline_mode<synchronous>, transform_indices = @transform_2, window_bounds = array<i64: 1, 32>}, {pipeline_mode = #tpu.pipeline_mode<synchronous>, transform_indices = @transform_3, window_bounds = array<i64: 32, 96>}, {pipeline_mode = #tpu.pipeline_mode<synchronous>, transform_indices = @transform_4, window_bounds = array<i64: 1, 96>}, {transform_indices = @transform_5, window_bounds = array<i64: 8, 32>}, {transform_indices = @transform_6, window_bounds = array<i64: 8, 32>}, {transform_indices = @transform_7, window_bounds = array<i64: 8, 32>}]} {
    %c0 = arith.constant 0 : index
    %c0_0 = arith.constant 0 : index
    %0 = vector.load %arg1[%c0, %c0_0] : memref<8x32xbf16, #tpu.memory_space<vmem>>, vector<8x32xbf16>
    %1 = arith.extf %0 : vector<8x32xbf16> to vector<8x32xf32>
    %cst = arith.constant dense<0.000000e+00> : vector<8xf32>
    %2 = vector.multi_reduction <add>, %1, %cst [1] : vector<8x32xf32> to vector<8xf32>
    %3 = vector.shape_cast %2 : vector<8xf32> to vector<8x1xf32>
    %cst_1 = arith.constant 3.200000e+01 : f32
    %4 = vector.broadcast %cst_1 : f32 to vector<8x1xf32>
    %5 = arith.divf %3, %4 : vector<8x1xf32>
    %6 = vector.broadcast %5 : vector<8x1xf32> to vector<8x32xf32>
    %7 = arith.subf %1, %6 : vector<8x32xf32>
    %8 = arith.mulf %7, %7 : vector<8x32xf32>
    %cst_2 = arith.constant dense<0.000000e+00> : vector<8xf32>
    %9 = vector.multi_reduction <add>, %8, %cst_2 [1] : vector<8x32xf32> to vector<8xf32>
    %10 = vector.shape_cast %9 : vector<8xf32> to vector<8x1xf32>
    %cst_3 = arith.constant 3.200000e+01 : f32
    %11 = vector.broadcast %cst_3 : f32 to vector<8x1xf32>
    %12 = arith.divf %10, %11 : vector<8x1xf32>
    %13 = vector.broadcast %5 : vector<8x1xf32> to vector<8x32xf32>
    %14 = arith.subf %1, %13 : vector<8x32xf32>
    %cst_4 = arith.constant 9.99999997E-7 : f32
    %15 = vector.broadcast %cst_4 : f32 to vector<8x1xf32>
    %16 = arith.addf %12, %15 : vector<8x1xf32>
    %17 = math.rsqrt %16 : vector<8x1xf32>
    %18 = vector.broadcast %17 : vector<8x1xf32> to vector<8x32xf32>
    %19 = arith.mulf %14, %18 : vector<8x32xf32>
    %c0_5 = arith.constant 0 : index
    %c0_6 = arith.constant 0 : index
    %20 = vector.load %arg2[%c0_5, %c0_6] : memref<1x32xf32, #tpu.memory_space<vmem>>, vector<1x32xf32>
    %21 = vector.broadcast %20 : vector<1x32xf32> to vector<8x32xf32>
    %22 = arith.mulf %19, %21 : vector<8x32xf32>
    %c0_7 = arith.constant 0 : index
    %c0_8 = arith.constant 0 : index
    %23 = vector.load %arg3[%c0_7, %c0_8] : memref<1x32xf32, #tpu.memory_space<vmem>>, vector<1x32xf32>
    %24 = vector.broadcast %23 : vector<1x32xf32> to vector<8x32xf32>
    %25 = arith.addf %22, %24 : vector<8x32xf32>
    %26 = arith.truncf %25 : vector<8x32xf32> to vector<8x32xbf16>
    %c0_9 = arith.constant 0 : index
    %c0_10 = arith.constant 0 : index
    %27 = vector.load %arg4[%c0_9, %c0_10] : memref<32x96xbf16, #tpu.memory_space<vmem>>, vector<32x96xbf16>
    %cst_11 = arith.constant dense<0.000000e+00> : vector<8x96xf32>
    %28 = tpu.matmul %26, %27, %cst_11 {dimension_numbers = #tpu.dot_dimension_numbers<[1], [0], [0], [1], [0, 0, 1, 1], [], []>} : vector<8x32xbf16>, vector<32x96xbf16>, vector<8x96xf32> -> vector<8x96xf32>
    %c0_12 = arith.constant 0 : index
    %c0_13 = arith.constant 0 : index
    %29 = vector.load %arg5[%c0_12, %c0_13] : memref<1x96xf32, #tpu.memory_space<vmem>>, vector<1x96xf32>
    %30 = vector.broadcast %29 : vector<1x96xf32> to vector<8x96xf32>
    %31 = arith.addf %28, %30 : vector<8x96xf32>
    %32 = vector.extract_strided_slice %31 {offsets = [0, 0], sizes = [8, 32], strides = [1, 1]} : vector<8x96xf32> to vector<8x32xf32>
    %33 = arith.truncf %32 : vector<8x32xf32> to vector<8x32xbf16>
    %c0_14 = arith.constant 0 : index
    %c0_15 = arith.constant 0 : index
    %34 = vector.load %arg6[%c0_14, %c0_15] : memref<8x32xbf16, #tpu.memory_space<vmem>>, vector<8x32xbf16>
    tpu.vector_store %arg6[%c0_14, %c0_15], %33 {strides = array<i32>} : memref<8x32xbf16, #tpu.memory_space<vmem>>, vector<8x32xbf16>,
    %35 = vector.extract_strided_slice %31 {offsets = [0, 32], sizes = [8, 32], strides = [1, 1]} : vector<8x96xf32> to vector<8x32xf32>
    %36 = arith.truncf %35 : vector<8x32xf32> to vector<8x32xbf16>
    %c0_16 = arith.constant 0 : index
    %c0_17 = arith.constant 0 : index
    %37 = vector.load %arg7[%c0_16, %c0_17] : memref<8x32xbf16, #tpu.memory_space<vmem>>, vector<8x32xbf16>
    tpu.vector_store %arg7[%c0_16, %c0_17], %36 {strides = array<i32>} : memref<8x32xbf16, #tpu.memory_space<vmem>>, vector<8x32xbf16>,
    %38 = vector.extract_strided_slice %31 {offsets = [0, 64], sizes = [8, 32], strides = [1, 1]} : vector<8x96xf32> to vector<8x32xf32>
    %39 = arith.truncf %38 : vector<8x32xf32> to vector<8x32xbf16>
    %c0_18 = arith.constant 0 : index
    %c0_19 = arith.constant 0 : index
    %40 = vector.load %arg8[%c0_18, %c0_19] : memref<8x32xbf16, #tpu.memory_space<vmem>>, vector<8x32xbf16>
    tpu.vector_store %arg8[%c0_18, %c0_19], %39 {strides = array<i32>} : memref<8x32xbf16, #tpu.memory_space<vmem>>, vector<8x32xbf16>,
    return
  }
  func.func @transform_0(%arg0: i32) -> (i32, i32) {
    %c0_i32 = arith.constant 0 : i32
    %c0_i32_0 = arith.constant 0 : i32
    return %arg0, %c0_i32 : i32, i32
  }
  func.func @transform_1(%arg0: i32) -> (i32, i32) {
    %c0_i32 = arith.constant 0 : i32
    %c0_i32_0 = arith.constant 0 : i32
    %c0_i32_1 = arith.constant 0 : i32
    return %c0_i32, %c0_i32_0 : i32, i32
  }
  func.func @transform_2(%arg0: i32) -> (i32, i32) {
    %c0_i32 = arith.constant 0 : i32
    %c0_i32_0 = arith.constant 0 : i32
    %c0_i32_1 = arith.constant 0 : i32
    return %c0_i32, %c0_i32_0 : i32, i32
  }
  func.func @transform_3(%arg0: i32) -> (i32, i32) {
    %c0_i32 = arith.constant 0 : i32
    %c0_i32_0 = arith.constant 0 : i32
    %c0_i32_1 = arith.constant 0 : i32
    return %c0_i32, %c0_i32_0 : i32, i32
  }
  func.func @transform_4(%arg0: i32) -> (i32, i32) {
    %c0_i32 = arith.constant 0 : i32
    %c0_i32_0 = arith.constant 0 : i32
    %c0_i32_1 = arith.constant 0 : i32
    return %c0_i32, %c0_i32_0 : i32, i32
  }
  func.func @transform_5(%arg0: i32) -> (i32, i32) {
    %c0_i32 = arith.constant 0 : i32
    %c0_i32_0 = arith.constant 0 : i32
    return %arg0, %c0_i32 : i32, i32
  }
  func.func @transform_6(%arg0: i32) -> (i32, i32) {
    %c0_i32 = arith.constant 0 : i32
    %c0_i32_0 = arith.constant 0 : i32
    return %arg0, %c0_i32 : i32, i32
  }
  func.func @transform_7(%arg0: i32) -> (i32, i32) {
    %c0_i32 = arith.constant 0 : i32
    %c0_i32_0 = arith.constant 0 : i32
    return %arg0, %c0_i32 : i32, i32
  }
}

module attributes {stable_mosaic.version = 11 : i64} {
  func.func @_flash_attn_out_kernel(%arg0: i32, %arg1: i32, %arg2: i32, %arg3: memref<1x4x32xbf16, #tpu.memory_space<vmem>>, %arg4: memref<1x4x32xbf16, #tpu.memory_space<vmem>>, %arg5: memref<1x4x32xbf16, #tpu.memory_space<vmem>>, %arg6: memref<32x32xbf16, #tpu.memory_space<vmem>>, %arg7: memref<1x32xf32, #tpu.memory_space<vmem>>, %arg8: memref<1x4x32xbf16, #tpu.memory_space<vmem>>, %arg9: memref<1x4x32xbf16, #tpu.memory_space<vmem>>, %arg10: memref<4x4x8xbf16, #tpu.memory_space<vmem>>, %arg11: memref<4x4x1xf32, #tpu.memory_space<vmem>>, %arg12: memref<4x4x1xf32, #tpu.memory_space<vmem>>, %arg13: memref<4x4x8xf32, #tpu.memory_space<vmem>>) attributes {dimension_semantics = [#tpu.dimension_semantics<parallel>, #tpu.dimension_semantics<parallel>, #tpu.dimension_semantics<arbitrary>], iteration_bounds = array<i64: 2, 1, 1>, scalar_prefetch = 0 : i64, scratch_operands = 4 : i64, tpu.core_type = #tpu.core_type<tc>, window_params = [{transform_indices = @transform_0, window_bounds = array<i64: 1, 4, 32>}, {transform_indices = @transform_1, window_bounds = array<i64: 1, 4, 32>}, {transform_indices = @transform_2, window_bounds = array<i64: 1, 4, 32>}, {pipeline_mode = #tpu.pipeline_mode<synchronous>, transform_indices = @transform_3, window_bounds = array<i64: 32, 32>}, {pipeline_mode = #tpu.pipeline_mode<synchronous>, transform_indices = @transform_4, window_bounds = array<i64: 1, 32>}, {transform_indices = @transform_5, window_bounds = array<i64: 1, 4, 32>}, {transform_indices = @transform_6, window_bounds = array<i64: 1, 4, 32>}]} {
    %c0_i32 = arith.constant 0 : i32
    %0 = arith.cmpi eq, %arg2, %c0_i32 : i32
    %1 = arith.extui %0 : i1 to i32
    %c0_i32_0 = arith.constant 0 : i32
    %2 = arith.cmpi ne, %1, %c0_i32_0 : i32
    scf.if %2 {
      %cst_33 = arith.constant 0xFF800000 : f32
      %41 = vector.broadcast %cst_33 : f32 to vector<4x4x1xf32>
      %c0_34 = arith.constant 0 : index
      %c0_35 = arith.constant 0 : index
      %c0_36 = arith.constant 0 : index
      %42 = vector.load %arg11[%c0_34, %c0_35, %c0_36] : memref<4x4x1xf32, #tpu.memory_space<vmem>>, vector<4x4x1xf32>
      tpu.vector_store %arg11[%c0_34, %c0_35, %c0_36], %41 {strides = array<i32>} : memref<4x4x1xf32, #tpu.memory_space<vmem>>, vector<4x4x1xf32>,
      %cst_37 = arith.constant 0.000000e+00 : f32
      %43 = vector.broadcast %cst_37 : f32 to vector<4x4x1xf32>
      %c0_38 = arith.constant 0 : index
      %c0_39 = arith.constant 0 : index
      %c0_40 = arith.constant 0 : index
      %44 = vector.load %arg12[%c0_38, %c0_39, %c0_40] : memref<4x4x1xf32, #tpu.memory_space<vmem>>, vector<4x4x1xf32>
      tpu.vector_store %arg12[%c0_38, %c0_39, %c0_40], %43 {strides = array<i32>} : memref<4x4x1xf32, #tpu.memory_space<vmem>>, vector<4x4x1xf32>,
      %cst_41 = arith.constant 0.000000e+00 : f32
      %45 = vector.broadcast %cst_41 : f32 to vector<4x4x8xf32>
      %c0_42 = arith.constant 0 : index
      %c0_43 = arith.constant 0 : index
      %c0_44 = arith.constant 0 : index
      %46 = vector.load %arg13[%c0_42, %c0_43, %c0_44] : memref<4x4x8xf32, #tpu.memory_space<vmem>>, vector<4x4x8xf32>
      tpu.vector_store %arg13[%c0_42, %c0_43, %c0_44], %45 {strides = array<i32>} : memref<4x4x8xf32, #tpu.memory_space<vmem>>, vector<4x4x8xf32>,
      %c0_45 = arith.constant 0 : index
      %c0_46 = arith.constant 0 : index
      %c0_47 = arith.constant 0 : index
      %47 = vector.load %arg3[%c0_45, %c0_46, %c0_47] : memref<1x4x32xbf16, #tpu.memory_space<vmem>>, vector<1x4x32xbf16>
      %48 = vector.shape_cast %47 : vector<1x4x32xbf16> to vector<4x32xbf16>
      %49 = vector.shape_cast %48 : vector<4x32xbf16> to vector<4x4x8xbf16>
      %50 = tpu.transpose %49, [1, 0, 2] : vector<4x4x8xbf16> -> vector<4x4x8xbf16>
      %c0_48 = arith.constant 0 : index
      %c0_49 = arith.constant 0 : index
      %c0_50 = arith.constant 0 : index
      %51 = vector.load %arg10[%c0_48, %c0_49, %c0_50] : memref<4x4x8xbf16, #tpu.memory_space<vmem>>, vector<4x4x8xbf16>
      tpu.vector_store %arg10[%c0_48, %c0_49, %c0_50], %50 {strides = array<i32>} : memref<4x4x8xbf16, #tpu.memory_space<vmem>>, vector<4x4x8xbf16>,
    } else {
    }
    %c0 = arith.constant 0 : index
    %c0_1 = arith.constant 0 : index
    %c0_2 = arith.constant 0 : index
    %3 = vector.load %arg4[%c0, %c0_1, %c0_2] : memref<1x4x32xbf16, #tpu.memory_space<vmem>>, vector<1x4x32xbf16>
    %4 = vector.shape_cast %3 : vector<1x4x32xbf16> to vector<4x32xbf16>
    %5 = vector.shape_cast %4 : vector<4x32xbf16> to vector<4x4x8xbf16>
    %6 = tpu.transpose %5, [1, 0, 2] : vector<4x4x8xbf16> -> vector<4x4x8xbf16>
    %c0_3 = arith.constant 0 : index
    %c0_4 = arith.constant 0 : index
    %c0_5 = arith.constant 0 : index
    %7 = vector.load %arg5[%c0_3, %c0_4, %c0_5] : memref<1x4x32xbf16, #tpu.memory_space<vmem>>, vector<1x4x32xbf16>
    %8 = vector.shape_cast %7 : vector<1x4x32xbf16> to vector<4x32xbf16>
    %9 = vector.shape_cast %8 : vector<4x32xbf16> to vector<4x4x8xbf16>
    %10 = tpu.transpose %9, [1, 0, 2] : vector<4x4x8xbf16> -> vector<4x4x8xbf16>
    %c0_6 = arith.constant 0 : index
    %c0_7 = arith.constant 0 : index
    %c0_8 = arith.constant 0 : index
    %11 = vector.load %arg10[%c0_6, %c0_7, %c0_8] : memref<4x4x8xbf16, #tpu.memory_space<vmem>>, vector<4x4x8xbf16>
    "tpu.trace_start"() <{level = 10 : i32, message = "hqd,hkd->hqk"}> : () -> ()
    %cst = arith.constant dense<0.000000e+00> : vector<4x4x4xf32>
    %12 = tpu.matmul %11, %6, %cst {dimension_numbers = #tpu.dot_dimension_numbers<[2], [2], [1], [1], [0, 0, 0, 1, 1, 1], [0], [0]>} : vector<4x4x8xbf16>, vector<4x4x8xbf16>, vector<4x4x4xf32> -> vector<4x4x4xf32>
    "tpu.trace_stop"() : () -> ()
    %cst_9 = arith.constant 0.353553385 : f32
    %13 = vector.broadcast %cst_9 : f32 to vector<4x4x4xf32>
    %14 = arith.mulf %12, %13 : vector<4x4x4xf32>
    %c0_10 = arith.constant 0 : index
    %c0_11 = arith.constant 0 : index
    %c0_12 = arith.constant 0 : index
    %15 = vector.load %arg11[%c0_10, %c0_11, %c0_12] : memref<4x4x1xf32, #tpu.memory_space<vmem>>, vector<4x4x1xf32>
    %cst_13 = arith.constant dense<0xFF800000> : vector<4x4xf32>
    %16 = vector.multi_reduction <maximumf>, %14, %cst_13 [2] : vector<4x4x4xf32> to vector<4x4xf32>
    %17 = vector.shape_cast %16 : vector<4x4xf32> to vector<4x4x1xf32>
    %18 = arith.maximumf %15, %17 : vector<4x4x1xf32>
    %19 = arith.subf %15, %18 : vector<4x4x1xf32>
    %20 = math.exp %19 : vector<4x4x1xf32>
    %21 = vector.broadcast %18 : vector<4x4x1xf32> to vector<4x4x4xf32>
    %22 = arith.subf %14, %21 : vector<4x4x4xf32>
    %23 = math.exp %22 : vector<4x4x4xf32>
    %c0_14 = arith.constant 0 : index
    %c0_15 = arith.constant 0 : index
    %c0_16 = arith.constant 0 : index
    %24 = vector.load %arg12[%c0_14, %c0_15, %c0_16] : memref<4x4x1xf32, #tpu.memory_space<vmem>>, vector<4x4x1xf32>
    %25 = arith.mulf %20, %24 : vector<4x4x1xf32>
    %cst_17 = arith.constant dense<0.000000e+00> : vector<4x4xf32>
    %26 = vector.multi_reduction <add>, %23, %cst_17 [2] : vector<4x4x4xf32> to vector<4x4xf32>
    %27 = vector.shape_cast %26 : vector<4x4xf32> to vector<4x4x1xf32>
    %28 = arith.addf %25, %27 : vector<4x4x1xf32>
    %c0_18 = arith.constant 0 : index
    %c0_19 = arith.constant 0 : index
    %c0_20 = arith.constant 0 : index
    %29 = vector.load %arg12[%c0_18, %c0_19, %c0_20] : memref<4x4x1xf32, #tpu.memory_space<vmem>>, vector<4x4x1xf32>
    tpu.vector_store %arg12[%c0_18, %c0_19, %c0_20], %28 {strides = array<i32>} : memref<4x4x1xf32, #tpu.memory_space<vmem>>, vector<4x4x1xf32>,
    %c0_21 = arith.constant 0 : index
    %c0_22 = arith.constant 0 : index
    %c0_23 = arith.constant 0 : index
    %30 = vector.load %arg13[%c0_21, %c0_22, %c0_23] : memref<4x4x8xf32, #tpu.memory_space<vmem>>, vector<4x4x8xf32>
    %31 = vector.broadcast %20 : vector<4x4x1xf32> to vector<4x4x8xf32>
    %32 = arith.mulf %31, %30 : vector<4x4x8xf32>
    %33 = arith.truncf %23 : vector<4x4x4xf32> to vector<4x4x4xbf16>
    "tpu.trace_start"() <{level = 10 : i32, message = "hqk,hkd->hqd"}> : () -> ()
    %cst_24 = arith.constant dense<0.000000e+00> : vector<4x4x8xf32>
    %34 = tpu.matmul %33, %10, %cst_24 {dimension_numbers = #tpu.dot_dimension_numbers<[2], [1], [1], [2], [0, 0, 0, 1, 1, 2], [0], [0]>} : vector<4x4x4xbf16>, vector<4x4x8xbf16>, vector<4x4x8xf32> -> vector<4x4x8xf32>
    "tpu.trace_stop"() : () -> ()
    %35 = arith.addf %32, %34 : vector<4x4x8xf32>
    %c0_25 = arith.constant 0 : index
    %c0_26 = arith.constant 0 : index
    %c0_27 = arith.constant 0 : index
    %36 = vector.load %arg13[%c0_25, %c0_26, %c0_27] : memref<4x4x8xf32, #tpu.memory_space<vmem>>, vector<4x4x8xf32>
    tpu.vector_store %arg13[%c0_25, %c0_26, %c0_27], %35 {strides = array<i32>} : memref<4x4x8xf32, #tpu.memory_space<vmem>>, vector<4x4x8xf32>,
    %c0_28 = arith.constant 0 : index
    %c0_29 = arith.constant 0 : index
    %c0_30 = arith.constant 0 : index
    %37 = vector.load %arg11[%c0_28, %c0_29, %c0_30] : memref<4x4x1xf32, #tpu.memory_space<vmem>>, vector<4x4x1xf32>
    tpu.vector_store %arg11[%c0_28, %c0_29, %c0_30], %18 {strides = array<i32>} : memref<4x4x1xf32, #tpu.memory_space<vmem>>, vector<4x4x1xf32>,
    %c0_i32_31 = arith.constant 0 : i32
    %38 = arith.cmpi eq, %arg2, %c0_i32_31 : i32
    %39 = arith.extui %38 : i1 to i32
    %c0_i32_32 = arith.constant 0 : i32
    %40 = arith.cmpi ne, %39, %c0_i32_32 : i32
    scf.if %40 {
      %c0_33 = arith.constant 0 : index
      %c0_34 = arith.constant 0 : index
      %c0_35 = arith.constant 0 : index
      %41 = vector.load %arg13[%c0_33, %c0_34, %c0_35] : memref<4x4x8xf32, #tpu.memory_space<vmem>>, vector<4x4x8xf32>
      %c0_36 = arith.constant 0 : index
      %c0_37 = arith.constant 0 : index
      %c0_38 = arith.constant 0 : index
      %42 = vector.load %arg12[%c0_36, %c0_37, %c0_38] : memref<4x4x1xf32, #tpu.memory_space<vmem>>, vector<4x4x1xf32>
      %43 = tpu.reciprocal %42 {approx = true} : vector<4x4x1xf32> -> vector<4x4x1xf32>
      %44 = vector.broadcast %43 : vector<4x4x1xf32> to vector<4x4x8xf32>
      %45 = arith.mulf %41, %44 : vector<4x4x8xf32>
      %46 = tpu.transpose %45, [1, 0, 2] : vector<4x4x8xf32> -> vector<4x4x8xf32>
      %47 = vector.shape_cast %46 : vector<4x4x8xf32> to vector<4x32xf32>
      %48 = arith.truncf %47 : vector<4x32xf32> to vector<4x32xbf16>
      %c0_39 = arith.constant 0 : index
      %c0_40 = arith.constant 0 : index
      %49 = vector.load %arg6[%c0_39, %c0_40] : memref<32x32xbf16, #tpu.memory_space<vmem>>, vector<32x32xbf16>
      %cst_41 = arith.constant dense<0.000000e+00> : vector<4x32xf32>
      %50 = tpu.matmul %48, %49, %cst_41 {dimension_numbers = #tpu.dot_dimension_numbers<[1], [0], [0], [1], [0, 0, 1, 1], [], []>} : vector<4x32xbf16>, vector<32x32xbf16>, vector<4x32xf32> -> vector<4x32xf32>
      %c0_42 = arith.constant 0 : index
      %c0_43 = arith.constant 0 : index
      %c0_44 = arith.constant 0 : index
      %51 = vector.load %arg8[%c0_42, %c0_43, %c0_44] : memref<1x4x32xbf16, #tpu.memory_space<vmem>>, vector<1x4x32xbf16>
      %52 = vector.shape_cast %51 : vector<1x4x32xbf16> to vector<4x32xbf16>
      %53 = arith.extf %52 : vector<4x32xbf16> to vector<4x32xf32>
      %54 = arith.addf %53, %50 : vector<4x32xf32>
      %c0_45 = arith.constant 0 : index
      %c0_46 = arith.constant 0 : index
      %55 = vector.load %arg7[%c0_45, %c0_46] : memref<1x32xf32, #tpu.memory_space<vmem>>, vector<1x32xf32>
      %56 = vector.broadcast %55 : vector<1x32xf32> to vector<4x32xf32>
      %57 = arith.addf %54, %56 : vector<4x32xf32>
      %58 = arith.truncf %57 : vector<4x32xf32> to vector<4x32xbf16>
      %c0_47 = arith.constant 0 : index
      %c0_48 = arith.constant 0 : index
      %c0_49 = arith.constant 0 : index
      %59 = vector.load %arg9[%c0_47, %c0_48, %c0_49] : memref<1x4x32xbf16, #tpu.memory_space<vmem>>, vector<1x4x32xbf16>
      %60 = vector.shape_cast %59 : vector<1x4x32xbf16> to vector<4x32xbf16>
      %61 = vector.shape_cast %58 : vector<4x32xbf16> to vector<1x4x32xbf16>
      tpu.vector_store %arg9[%c0_47, %c0_48, %c0_49], %61 {strides = array<i32>} : memref<1x4x32xbf16, #tpu.memory_space<vmem>>, vector<1x4x32xbf16>,
    } else {
    }
    return
  }
  func.func @transform_0(%arg0: i32, %arg1: i32, %arg2: i32) -> (i32, i32, i32) {
    %c0_i32 = arith.constant 0 : i32
    %c0_i32_0 = arith.constant 0 : i32
    return %arg0, %arg1, %c0_i32 : i32, i32, i32
  }
  func.func @transform_1(%arg0: i32, %arg1: i32, %arg2: i32) -> (i32, i32, i32) {
    %c0_i32 = arith.constant 0 : i32
    %c0_i32_0 = arith.constant 0 : i32
    return %arg0, %arg2, %c0_i32 : i32, i32, i32
  }
  func.func @transform_2(%arg0: i32, %arg1: i32, %arg2: i32) -> (i32, i32, i32) {
    %c0_i32 = arith.constant 0 : i32
    %c0_i32_0 = arith.constant 0 : i32
    return %arg0, %arg2, %c0_i32 : i32, i32, i32
  }
  func.func @transform_3(%arg0: i32, %arg1: i32, %arg2: i32) -> (i32, i32) {
    %c0_i32 = arith.constant 0 : i32
    %c0_i32_0 = arith.constant 0 : i32
    %c0_i32_1 = arith.constant 0 : i32
    return %c0_i32, %c0_i32_0 : i32, i32
  }
  func.func @transform_4(%arg0: i32, %arg1: i32, %arg2: i32) -> (i32, i32) {
    %c0_i32 = arith.constant 0 : i32
    %c0_i32_0 = arith.constant 0 : i32
    %c0_i32_1 = arith.constant 0 : i32
    return %c0_i32, %c0_i32_0 : i32, i32
  }
  func.func @transform_5(%arg0: i32, %arg1: i32, %arg2: i32) -> (i32, i32, i32) {
    %c0_i32 = arith.constant 0 : i32
    %c0_i32_0 = arith.constant 0 : i32
    return %arg0, %arg1, %c0_i32 : i32, i32, i32
  }
  func.func @transform_6(%arg0: i32, %arg1: i32, %arg2: i32) -> (i32, i32, i32) {
    %c0_i32 = arith.constant 0 : i32
    %c0_i32_0 = arith.constant 0 : i32
    return %arg0, %arg1, %c0_i32 : i32, i32, i32
  }
}

module attributes {stable_mosaic.version = 11 : i64} {
  func.func @_ln_mlp_kernel(%arg0: i32, %arg1: i32, %arg2: memref<8x32xbf16, #tpu.memory_space<vmem>>, %arg3: memref<1x32xf32, #tpu.memory_space<vmem>>, %arg4: memref<1x32xf32, #tpu.memory_space<vmem>>, %arg5: memref<32x64xbf16, #tpu.memory_space<vmem>>, %arg6: memref<1x64xf32, #tpu.memory_space<vmem>>, %arg7: memref<64x32xbf16, #tpu.memory_space<vmem>>, %arg8: memref<1x32xf32, #tpu.memory_space<vmem>>, %arg9: memref<8x32xbf16, #tpu.memory_space<vmem>>, %arg10: memref<8x32xbf16, #tpu.memory_space<vmem>>, %arg11: memref<8x32xf32, #tpu.memory_space<vmem>>) attributes {dimension_semantics = [#tpu.dimension_semantics<parallel>, #tpu.dimension_semantics<arbitrary>], iteration_bounds = array<i64: 1, 1>, scalar_prefetch = 0 : i64, scratch_operands = 2 : i64, tpu.core_type = #tpu.core_type<tc>, window_params = [{transform_indices = @transform_0, window_bounds = array<i64: 8, 32>}, {pipeline_mode = #tpu.pipeline_mode<synchronous>, transform_indices = @transform_1, window_bounds = array<i64: 1, 32>}, {pipeline_mode = #tpu.pipeline_mode<synchronous>, transform_indices = @transform_2, window_bounds = array<i64: 1, 32>}, {transform_indices = @transform_3, window_bounds = array<i64: 32, 64>}, {transform_indices = @transform_4, window_bounds = array<i64: 1, 64>}, {transform_indices = @transform_5, window_bounds = array<i64: 64, 32>}, {pipeline_mode = #tpu.pipeline_mode<synchronous>, transform_indices = @transform_6, window_bounds = array<i64: 1, 32>}, {transform_indices = @transform_7, window_bounds = array<i64: 8, 32>}]} {
    %c0_i32 = arith.constant 0 : i32
    %0 = arith.cmpi eq, %arg1, %c0_i32 : i32
    %1 = arith.extui %0 : i1 to i32
    %c0_i32_0 = arith.constant 0 : i32
    %2 = arith.cmpi ne, %1, %c0_i32_0 : i32
    scf.if %2 {
      %c0_19 = arith.constant 0 : index
      %c0_20 = arith.constant 0 : index
      %31 = vector.load %arg2[%c0_19, %c0_20] : memref<8x32xbf16, #tpu.memory_space<vmem>>, vector<8x32xbf16>
      %32 = arith.extf %31 : vector<8x32xbf16> to vector<8x32xf32>
      %cst_21 = arith.constant dense<0.000000e+00> : vector<8xf32>
      %33 = vector.multi_reduction <add>, %32, %cst_21 [1] : vector<8x32xf32> to vector<8xf32>
      %34 = vector.shape_cast %33 : vector<8xf32> to vector<8x1xf32>
      %cst_22 = arith.constant 3.200000e+01 : f32
      %35 = vector.broadcast %cst_22 : f32 to vector<8x1xf32>
      %36 = arith.divf %34, %35 : vector<8x1xf32>
      %37 = vector.broadcast %36 : vector<8x1xf32> to vector<8x32xf32>
      %38 = arith.subf %32, %37 : vector<8x32xf32>
      %39 = arith.mulf %38, %38 : vector<8x32xf32>
      %cst_23 = arith.constant dense<0.000000e+00> : vector<8xf32>
      %40 = vector.multi_reduction <add>, %39, %cst_23 [1] : vector<8x32xf32> to vector<8xf32>
      %41 = vector.shape_cast %40 : vector<8xf32> to vector<8x1xf32>
      %cst_24 = arith.constant 3.200000e+01 : f32
      %42 = vector.broadcast %cst_24 : f32 to vector<8x1xf32>
      %43 = arith.divf %41, %42 : vector<8x1xf32>
      %44 = vector.broadcast %36 : vector<8x1xf32> to vector<8x32xf32>
      %45 = arith.subf %32, %44 : vector<8x32xf32>
      %cst_25 = arith.constant 9.99999997E-7 : f32
      %46 = vector.broadcast %cst_25 : f32 to vector<8x1xf32>
      %47 = arith.addf %43, %46 : vector<8x1xf32>
      %48 = math.rsqrt %47 : vector<8x1xf32>
      %49 = vector.broadcast %48 : vector<8x1xf32> to vector<8x32xf32>
      %50 = arith.mulf %45, %49 : vector<8x32xf32>
      %c0_26 = arith.constant 0 : index
      %c0_27 = arith.constant 0 : index
      %51 = vector.load %arg3[%c0_26, %c0_27] : memref<1x32xf32, #tpu.memory_space<vmem>>, vector<1x32xf32>
      %52 = vector.broadcast %51 : vector<1x32xf32> to vector<8x32xf32>
      %53 = arith.mulf %50, %52 : vector<8x32xf32>
      %c0_28 = arith.constant 0 : index
      %c0_29 = arith.constant 0 : index
      %54 = vector.load %arg4[%c0_28, %c0_29] : memref<1x32xf32, #tpu.memory_space<vmem>>, vector<1x32xf32>
      %55 = vector.broadcast %54 : vector<1x32xf32> to vector<8x32xf32>
      %56 = arith.addf %53, %55 : vector<8x32xf32>
      %57 = arith.truncf %56 : vector<8x32xf32> to vector<8x32xbf16>
      %c0_30 = arith.constant 0 : index
      %c0_31 = arith.constant 0 : index
      %58 = vector.load %arg10[%c0_30, %c0_31] : memref<8x32xbf16, #tpu.memory_space<vmem>>, vector<8x32xbf16>
      tpu.vector_store %arg10[%c0_30, %c0_31], %57 {strides = array<i32>} : memref<8x32xbf16, #tpu.memory_space<vmem>>, vector<8x32xbf16>,
      %cst_32 = arith.constant 0.000000e+00 : f32
      %59 = vector.broadcast %cst_32 : f32 to vector<8x32xf32>
      %c0_33 = arith.constant 0 : index
      %c0_34 = arith.constant 0 : index
      %60 = vector.load %arg11[%c0_33, %c0_34] : memref<8x32xf32, #tpu.memory_space<vmem>>, vector<8x32xf32>
      tpu.vector_store %arg11[%c0_33, %c0_34], %59 {strides = array<i32>} : memref<8x32xf32, #tpu.memory_space<vmem>>, vector<8x32xf32>,
    } else {
    }
    %c0 = arith.constant 0 : index
    %c0_1 = arith.constant 0 : index
    %3 = vector.load %arg10[%c0, %c0_1] : memref<8x32xbf16, #tpu.memory_space<vmem>>, vector<8x32xbf16>
    %c0_2 = arith.constant 0 : index
    %c0_3 = arith.constant 0 : index
    %4 = vector.load %arg5[%c0_2, %c0_3] : memref<32x64xbf16, #tpu.memory_space<vmem>>, vector<32x64xbf16>
    %cst = arith.constant dense<0.000000e+00> : vector<8x64xf32>
    %5 = tpu.matmul %3, %4, %cst {dimension_numbers = #tpu.dot_dimension_numbers<[1], [0], [0], [1], [0, 0, 1, 1], [], []>} : vector<8x32xbf16>, vector<32x64xbf16>, vector<8x64xf32> -> vector<8x64xf32>
    %c0_4 = arith.constant 0 : index
    %c0_5 = arith.constant 0 : index
    %6 = vector.load %arg6[%c0_4, %c0_5] : memref<1x64xf32, #tpu.memory_space<vmem>>, vector<1x64xf32>
    %7 = vector.broadcast %6 : vector<1x64xf32> to vector<8x64xf32>
    %8 = arith.addf %5, %7 : vector<8x64xf32>
    %cst_6 = arith.constant 5.000000e-01 : f32
    %9 = vector.broadcast %cst_6 : f32 to vector<8x64xf32>
    %10 = arith.mulf %9, %8 : vector<8x64xf32>
    %cst_7 = arith.constant 4.471500e-02 : f32
    %11 = vector.broadcast %cst_7 : f32 to vector<8x64xf32>
    %12 = arith.mulf %11, %8 : vector<8x64xf32>
    %13 = arith.mulf %12, %8 : vector<8x64xf32>
    %14 = arith.mulf %13, %8 : vector<8x64xf32>
    %15 = arith.addf %8, %14 : vector<8x64xf32>
    %cst_8 = arith.constant 0.797884583 : f32
    %16 = vector.broadcast %cst_8 : f32 to vector<8x64xf32>
    %17 = arith.mulf %16, %15 : vector<8x64xf32>
    %18 = math.tanh %17 : vector<8x64xf32>
    %cst_9 = arith.constant 1.000000e+00 : f32
    %19 = vector.broadcast %cst_9 : f32 to vector<8x64xf32>
    %20 = arith.addf %19, %18 : vector<8x64xf32>
    %21 = arith.mulf %10, %20 : vector<8x64xf32>
    %c0_10 = arith.constant 0 : index
    %c0_11 = arith.constant 0 : index
    %22 = vector.load %arg11[%c0_10, %c0_11] : memref<8x32xf32, #tpu.memory_space<vmem>>, vector<8x32xf32>
    %23 = arith.truncf %21 : vector<8x64xf32> to vector<8x64xbf16>
    %c0_12 = arith.constant 0 : index
    %c0_13 = arith.constant 0 : index
    %24 = vector.load %arg7[%c0_12, %c0_13] : memref<64x32xbf16, #tpu.memory_space<vmem>>, vector<64x32xbf16>
    %cst_14 = arith.constant dense<0.000000e+00> : vector<8x32xf32>
    %25 = tpu.matmul %23, %24, %cst_14 {dimension_numbers = #tpu.dot_dimension_numbers<[1], [0], [0], [1], [0, 0, 1, 1], [], []>} : vector<8x64xbf16>, vector<64x32xbf16>, vector<8x32xf32> -> vector<8x32xf32>
    %26 = arith.addf %22, %25 : vector<8x32xf32>
    %c0_15 = arith.constant 0 : index
    %c0_16 = arith.constant 0 : index
    %27 = vector.load %arg11[%c0_15, %c0_16] : memref<8x32xf32, #tpu.memory_space<vmem>>, vector<8x32xf32>
    tpu.vector_store %arg11[%c0_15, %c0_16], %26 {strides = array<i32>} : memref<8x32xf32, #tpu.memory_space<vmem>>, vector<8x32xf32>,
    %c0_i32_17 = arith.constant 0 : i32
    %28 = arith.cmpi eq, %arg1, %c0_i32_17 : i32
    %29 = arith.extui %28 : i1 to i32
    %c0_i32_18 = arith.constant 0 : i32
    %30 = arith.cmpi ne, %29, %c0_i32_18 : i32
    scf.if %30 {
      %c0_19 = arith.constant 0 : index
      %c0_20 = arith.constant 0 : index
      %31 = vector.load %arg2[%c0_19, %c0_20] : memref<8x32xbf16, #tpu.memory_space<vmem>>, vector<8x32xbf16>
      %32 = arith.extf %31 : vector<8x32xbf16> to vector<8x32xf32>
      %c0_21 = arith.constant 0 : index
      %c0_22 = arith.constant 0 : index
      %33 = vector.load %arg11[%c0_21, %c0_22] : memref<8x32xf32, #tpu.memory_space<vmem>>, vector<8x32xf32>
      %34 = arith.addf %32, %33 : vector<8x32xf32>
      %c0_23 = arith.constant 0 : index
      %c0_24 = arith.constant 0 : index
      %35 = vector.load %arg8[%c0_23, %c0_24] : memref<1x32xf32, #tpu.memory_space<vmem>>, vector<1x32xf32>
      %36 = vector.broadcast %35 : vector<1x32xf32> to vector<8x32xf32>
      %37 = arith.addf %34, %36 : vector<8x32xf32>
      %38 = arith.truncf %37 : vector<8x32xf32> to vector<8x32xbf16>
      %c0_25 = arith.constant 0 : index
      %c0_26 = arith.constant 0 : index
      %39 = vector.load %arg9[%c0_25, %c0_26] : memref<8x32xbf16, #tpu.memory_space<vmem>>, vector<8x32xbf16>
      tpu.vector_store %arg9[%c0_25, %c0_26], %38 {strides = array<i32>} : memref<8x32xbf16, #tpu.memory_space<vmem>>, vector<8x32xbf16>,
    } else {
    }
    return
  }
  func.func @transform_0(%arg0: i32, %arg1: i32) -> (i32, i32) {
    %c0_i32 = arith.constant 0 : i32
    %c0_i32_0 = arith.constant 0 : i32
    return %arg0, %c0_i32 : i32, i32
  }
  func.func @transform_1(%arg0: i32, %arg1: i32) -> (i32, i32) {
    %c0_i32 = arith.constant 0 : i32
    %c0_i32_0 = arith.constant 0 : i32
    %c0_i32_1 = arith.constant 0 : i32
    return %c0_i32, %c0_i32_0 : i32, i32
  }
  func.func @transform_2(%arg0: i32, %arg1: i32) -> (i32, i32) {
    %c0_i32 = arith.constant 0 : i32
    %c0_i32_0 = arith.constant 0 : i32
    %c0_i32_1 = arith.constant 0 : i32
    return %c0_i32, %c0_i32_0 : i32, i32
  }
  func.func @transform_3(%arg0: i32, %arg1: i32) -> (i32, i32) {
    %c0_i32 = arith.constant 0 : i32
    %c0_i32_0 = arith.constant 0 : i32
    return %c0_i32, %arg1 : i32, i32
  }
  func.func @transform_4(%arg0: i32, %arg1: i32) -> (i32, i32) {
    %c0_i32 = arith.constant 0 : i32
    %c0_i32_0 = arith.constant 0 : i32
    return %c0_i32, %arg1 : i32, i32
  }
  func.func @transform_5(%arg0: i32, %arg1: i32) -> (i32, i32) {
    %c0_i32 = arith.constant 0 : i32
    %c0_i32_0 = arith.constant 0 : i32
    return %arg1, %c0_i32 : i32, i32
  }
  func.func @transform_6(%arg0: i32, %arg1: i32) -> (i32, i32) {
    %c0_i32 = arith.constant 0 : i32
    %c0_i32_0 = arith.constant 0 : i32
    %c0_i32_1 = arith.constant 0 : i32
    return %c0_i32, %c0_i32_0 : i32, i32
  }
  func.func @transform_7(%arg0: i32, %arg1: i32) -> (i32, i32) {
    %c0_i32 = arith.constant 0 : i32
    %c0_i32_0 = arith.constant 0 : i32
    return %arg0, %c0_i32 : i32, i32
  }
}

module attributes {stable_mosaic.version = 11 : i64} {
  func.func @_layernorm_kernel(%arg0: i32, %arg1: memref<8x32xbf16, #tpu.memory_space<vmem>>, %arg2: memref<1x32xf32, #tpu.memory_space<vmem>>, %arg3: memref<1x32xf32, #tpu.memory_space<vmem>>, %arg4: memref<8x32xf32, #tpu.memory_space<vmem>>) attributes {dimension_semantics = [#tpu.dimension_semantics<parallel>], iteration_bounds = array<i64: 1>, scalar_prefetch = 0 : i64, scratch_operands = 0 : i64, tpu.core_type = #tpu.core_type<tc>, window_params = [{transform_indices = @transform_0, window_bounds = array<i64: 8, 32>}, {pipeline_mode = #tpu.pipeline_mode<synchronous>, transform_indices = @transform_1, window_bounds = array<i64: 1, 32>}, {pipeline_mode = #tpu.pipeline_mode<synchronous>, transform_indices = @transform_2, window_bounds = array<i64: 1, 32>}, {transform_indices = @transform_3, window_bounds = array<i64: 8, 32>}]} {
    %c0 = arith.constant 0 : index
    %c0_0 = arith.constant 0 : index
    %0 = vector.load %arg1[%c0, %c0_0] : memref<8x32xbf16, #tpu.memory_space<vmem>>, vector<8x32xbf16>
    %1 = arith.extf %0 : vector<8x32xbf16> to vector<8x32xf32>
    %cst = arith.constant dense<0.000000e+00> : vector<8xf32>
    %2 = vector.multi_reduction <add>, %1, %cst [1] : vector<8x32xf32> to vector<8xf32>
    %3 = vector.shape_cast %2 : vector<8xf32> to vector<8x1xf32>
    %cst_1 = arith.constant 3.200000e+01 : f32
    %4 = vector.broadcast %cst_1 : f32 to vector<8x1xf32>
    %5 = arith.divf %3, %4 : vector<8x1xf32>
    %6 = vector.broadcast %5 : vector<8x1xf32> to vector<8x32xf32>
    %7 = arith.subf %1, %6 : vector<8x32xf32>
    %8 = arith.mulf %7, %7 : vector<8x32xf32>
    %cst_2 = arith.constant dense<0.000000e+00> : vector<8xf32>
    %9 = vector.multi_reduction <add>, %8, %cst_2 [1] : vector<8x32xf32> to vector<8xf32>
    %10 = vector.shape_cast %9 : vector<8xf32> to vector<8x1xf32>
    %cst_3 = arith.constant 3.200000e+01 : f32
    %11 = vector.broadcast %cst_3 : f32 to vector<8x1xf32>
    %12 = arith.divf %10, %11 : vector<8x1xf32>
    %13 = vector.broadcast %5 : vector<8x1xf32> to vector<8x32xf32>
    %14 = arith.subf %1, %13 : vector<8x32xf32>
    %cst_4 = arith.constant 9.99999997E-7 : f32
    %15 = vector.broadcast %cst_4 : f32 to vector<8x1xf32>
    %16 = arith.addf %12, %15 : vector<8x1xf32>
    %17 = math.rsqrt %16 : vector<8x1xf32>
    %18 = vector.broadcast %17 : vector<8x1xf32> to vector<8x32xf32>
    %19 = arith.mulf %14, %18 : vector<8x32xf32>
    %c0_5 = arith.constant 0 : index
    %c0_6 = arith.constant 0 : index
    %20 = vector.load %arg2[%c0_5, %c0_6] : memref<1x32xf32, #tpu.memory_space<vmem>>, vector<1x32xf32>
    %21 = vector.broadcast %20 : vector<1x32xf32> to vector<8x32xf32>
    %22 = arith.mulf %19, %21 : vector<8x32xf32>
    %c0_7 = arith.constant 0 : index
    %c0_8 = arith.constant 0 : index
    %23 = vector.load %arg3[%c0_7, %c0_8] : memref<1x32xf32, #tpu.memory_space<vmem>>, vector<1x32xf32>
    %24 = vector.broadcast %23 : vector<1x32xf32> to vector<8x32xf32>
    %25 = arith.addf %22, %24 : vector<8x32xf32>
    %c0_9 = arith.constant 0 : index
    %c0_10 = arith.constant 0 : index
    %26 = vector.load %arg4[%c0_9, %c0_10] : memref<8x32xf32, #tpu.memory_space<vmem>>, vector<8x32xf32>
    tpu.vector_store %arg4[%c0_9, %c0_10], %25 {strides = array<i32>} : memref<8x32xf32, #tpu.memory_space<vmem>>, vector<8x32xf32>,
    return
  }
  func.func @transform_0(%arg0: i32) -> (i32, i32) {
    %c0_i32 = arith.constant 0 : i32
    %c0_i32_0 = arith.constant 0 : i32
    return %arg0, %c0_i32 : i32, i32
  }
  func.func @transform_1(%arg0: i32) -> (i32, i32) {
    %c0_i32 = arith.constant 0 : i32
    %c0_i32_0 = arith.constant 0 : i32
    %c0_i32_1 = arith.constant 0 : i32
    return %c0_i32, %c0_i32_0 : i32, i32
  }
  func.func @transform_2(%arg0: i32) -> (i32, i32) {
    %c0_i32 = arith.constant 0 : i32
    %c0_i32_0 = arith.constant 0 : i32
    %c0_i32_1 = arith.constant 0 : i32
    return %c0_i32, %c0_i32_0 : i32, i32
  }
  func.func @transform_3(%arg0: i32) -> (i32, i32) {
    %c0_i32 = arith.constant 0 : i32
    %c0_i32_0 = arith.constant 0 : i32
    return %arg0, %c0_i32 : i32, i32
  }
}

</mosaic_0001>

<bundles_post_ra>
// kernel: tpu_custom_call.1
= control target key start
LH: loop header
LB: loop body
LE: loop exit
PB: predicated region body
PF: predicated region fallthrough
CT: control target
= control target key end

     0   :  { %6 = vsyncpa [#allocation3], 0  ;;  %s287_s0 = inlined_call_operand.hbm [shape: f32[8,128], index: 0, kind: input, shape index: {}]   ;;  %s288_s1 = inlined_call_operand.hbm [shape: f32[8,128], index: 1, kind: output, shape index: {}]  }
   0x1   :  { %7 = vsyncpa [#allocation4], 0  ;;  %s270_s6 = smov 0  }
   0x2 LB: > { %s149_s7 = sadd.s32 4294967295, %s256_s6   ;;  %p150_p0 = scmp.ge.s32.totalorder %s256_s6, 1  ;;  %s256_s6 = sphi %s270_s6, %s13_s6  }
   0x3   : > { %p60_p1 = scmp.lt.s32.totalorder %s256_s6, 3  ;;  %s72_s10 = sshll.u32 %s287_s0, 4  ;;  %s73_s10 = int_to_ptr.hbm [resolvable:$true] %s72_s10 }
   0x4   : > { %p170_p3 = scmp.eq.s32.totalorder %s149_s7, 0  ;;  %s258_s11 = smov [#allocation2]  }
   0x5   : > { %p61_p2 = pnand %p150_p0, %p60_p1  ;;  %s74_s12 = sshll.u32 %s258_s11, 4  ;;  %s75_s12 = int_to_ptr.vmem [resolvable:$true] %s74_s12 }
   0x7   : > { %p166_p4 = pneg %p61_p2  ;;  %87 = sbr.rel (%p61_p2) target bundleno = 20 (0x14), region = 24 }
   0x9   : > { %p167_p5 = pnand %p170_p3, %p166_p4 }
   0xb   : > { %169 = dma.hbm_to_vmem [thread:$0]  (!%p167_p5), %s73_s10, 128, %s75_s12, [#allocation3]  }
   0xc   : > { %247 = dma.done.wait (%p170_p3), [#allocation3], 128  }
   0xd   : > { %249 = vsyncadd (%p170_p3), [#allocation3], 4294967168  ;;  %s259_s13 = smov [#allocation5]   ;;  %s109_s17 = sshll.u32 %s288_s1, 4  ;;  %v98_v0 = vld [vmem:[#allocation2] sm:$0xff]  ;;  %s110_s17 = int_to_ptr.hbm [resolvable:$true] %s109_s17 }
   0xe   : > { %s107_s14 = sshll.u32 %s259_s13, 4  ;;  %p172_p6 = scmp.eq.s32.totalorder %s149_s7, 1  ;;  %v99_v1 = vadd.f32 1.0, %v98_v0  ;;  %s108_s14 = int_to_ptr.vmem [resolvable:$true] %s107_s14 }
  0x10   : > { %100 = vst [vmem:[#allocation5] sm:$0xff] %v99_v1 }
  0x11   : > { %163 = dma.vmem_to_hbm [thread:$0]  (%p172_p6), %s108_s14, 128, %s110_s17, [#allocation4]  }
  0x12   : > { %251 = dma.done.wait (%p172_p6), [#allocation4], 128  }
  0x13   : > { %253 = vsyncadd (%p172_p6), [#allocation4], 4294967168 }
  0x14 PF: > { %s13_s6 = sadd.s32 1, %s256_s6  }
  0x15   : > { %p10_p7 = scmp.ge.s32.totalorder %s13_s6, 4  }
  0x17   :  { %12 = sbr.rel (!%p10_p7) target bundleno = 2 (0x2), region = 53 }
  0x1c   :  { %123 = vsyncpa [#allocation3], 1 }
  0x1d   :  { %125 = vsyncpa [#allocation3 + $0x1], 1 }
  0x1e   :  { %126 = vsyncpa [#allocation4], 1 }
  0x1f   :  { %128 = vsyncpa [#allocation4 + $0x1], 1 }

// kernel: siglip_vision_model.8
= control target key start
LH: loop header
LB: loop body
LE: loop exit
PB: predicated region body
PF: predicated region fallthrough
CT: control target
= control target key end

     0   :  { %s631_s15 = smov 0   ;;  %s633_s16 = smov 0   ;;  %s710_s0 = inlined_call_operand.vmem [shape: bf16[2,4,192], index: 0, kind: input, shape index: {}]   ;;  %s711_s1 = inlined_call_operand.vmem [shape: bf16[192,32], index: 1, kind: input, shape index: {}]   ;;  %s712_s2 = inlined_call_operand.vmem [shape: f32[1,32], index: 2, kind: input, shape index: {}]   ;;  %s713_s3 = inlined_call_operand.vmem [shape: f32[4,32], index: 3, kind: input, shape index: {}]   ;;  %s714_s4 = inlined_call_operand.vmem [shape: bf16[2,4,32], index: 4, kind: output, shape index: {}]  }
   0x1   :  { %s635_s17 = smov 0  }
   0x2 LB: > { %s26_s18 = sadd.s32 1, %s600_s16  ;;  %p489_p0 = scmp.ge.s32.totalorder %s604_s17, 1  ;;  %s604_s17 = sphi %s635_s17, %s14_s17   ;;  %s600_s16 = sphi %s633_s16, %s716_s16   ;;  %s596_s15 = sphi %s631_s15, %s715_s15  }
   0x3   : > { %p28_p1 = scmp.ge.s32.totalorder %s26_s18, 2  ;;  %p191_p2 = scmp.lt.s32.totalorder %s604_s17, 3 }
   0x5   : > { %s718_s18 = smov (%p28_p1, %s26_s18), 0  ;;  %p192_p3 = pnand %p489_p0, %p191_p2 }
   0x6   : > { %p227_p4 = scmp.lt.s32.totalorder (!%p192_p3), %s596_s15, 1 }
   0x7   : > { %195 = sbr.rel (%p192_p3) target bundleno = 179 (0xb3), region = 36 }
   0xc   : > { %v552_v0 = vld [vmem:[%s711_s1 + $0x38] sm:$0xff]  ;;  %v551_v2 = vld [vmem:[%s711_s1 + $0x30] sm:$0xff]  ;;  %s720_s15 = smov (!%p227_p4, %s596_s15), 1  ;;  %v550_v4 = vld [vmem:[%s711_s1 + $0x28] sm:$0xff]  ;;  %vm354_vm0 = vcmask 523264   ;;  %vm386_vm1 = vcmask 254976  }
   0xd   : > { %v556_v1 = vld [vmem:[%s711_s1 + $0x58] sm:$0xff]  ;;  %357 = vmatpush.bf16.msra.mxu0 %v552_v0  ;;  %v555_v3 = vld [vmem:[%s711_s1 + $0x50] sm:$0xff]  ;;  %s544_s27 = sshll.u32 %s720_s15, 2  ;;  %v554_v6 = vld [vmem:[%s711_s1 + $0x48] sm:$0xff]  ;;  %s492_s29 = sshll.u32 %s720_s15, 1 }
   0xe   : > { %374 = vmatpush.bf16.msra.mxu1 %v556_v1  ;;  %s235_s30 = scalar_lea.vmem %s710_s0, %s544_s27  ;;  %v549_v7 = vld [vmem:[%s711_s1 + $0x20] sm:$0xff]  ;;  %v548_v9 = vld [vmem:[%s711_s1 + $0x18] sm:$0xff]  ;;  %v547_v11 = vld [vmem:[%s711_s1 + $0x10] sm:$0xff]  ;;  %s246_s6 = scalar_lea.vmem %s714_s4, %s492_s29 }
   0xf   : > { %v248_v5 = vld [vmem:[%s235_s30] sm:$0xf]  ;;  %v546_v12 = vld [vmem:[%s711_s1 + $0x8] sm:$0xff] }
  0x10   : > { %278 = vst [vmem:[#allocation1] ss:$4 sm:$0xff] %v248_v5  ;;  %v553_v8 = vld [vmem:[%s711_s1 + $0x40] sm:$0xff] }
  0x11   : > { %358 = vmatpush.bf16.msra.mxu0 %v551_v2  ;;  %v545_v13 = vld [vmem:[%s711_s1] sm:$0xff] }
  0x12   : > { %375 = vmatpush.bf16.msra.mxu1 %v555_v3  ;;  %v581_v17 = vld [vmem:[%s712_s2] ss:$0 sm:$0xff] }
  0x13   : > { %v383_v20 = vld [vmem:[%s713_s3] sm:$0xf] }
  0x15   : > { %359 = vmatpush.bf16.msra.mxu0 %v550_v4 }
  0x16   : > { %376 = vmatpush.bf16.msra.mxu1 %v554_v6 }
  0x17   : > { %v280_v10 = vld.sshfl [vmem:[#allocation1 + $0x8] sm:$0xff pattern:$0x73625140]  ;;  %v279_v14 = vld.sshfl [vmem:[#allocation1] sm:$0xff pattern:$0x73625140] }
  0x19   : > { %360 = vmatpush.bf16.msra.mxu0 %v549_v7 }
  0x1a   : > { %377 = vmatpush.bf16.msra.mxu1 %v553_v8 }
  0x1d   : > { %361 = vmatpush.bf16.msra.mxu0 %v548_v9  ;;  %541 = vmatmul.msk.bf16.vlgmr.msra.gmra.mxu1 %vm354_vm0, %v280_v10 }
  0x21   : > { %362 = vmatpush.bf16.msra.mxu0 %v547_v11 }
  0x25   : > { %363 = vmatpush.bf16.msra.mxu0 %v546_v12 }
  0x29   : > { %364 = vmatpush.bf16.msra.mxu0 %v545_v13 }
  0x2c   : > { %365 = vmatmul.bf16.vlgmr.msra.gmra.mxu0 %v279_v14 }
  0x9a   : > { %v379_v15 = vpop.f32.mrf.mxu1 }
  0xa2   : > { %v381_v16 = vpop.f32.mrf.mxu1 }
  0xa9   : > { %v366_v18 = vpop.f32.mrf.mxu0 }
  0xaa   : > { %v367_v19 = vadd.f32 %v581_v17, %v366_v18 }
  0xac   : > { %v380_v21 = vadd.f32 %v379_v15, %v367_v19 }
  0xae   : > { %v384_v22 = vadd.f32 %v383_v20, %v380_v21 }
  0xb0   : > { %v385_v23 = vpack.c.bf16 %v384_v22, %v384_v22 }
  0xb1   : > { %v368_v24 = vpop.f32.mrf.mxu0 }
  0xb2   : > { %387 = vst.msk [vmem:[%s246_s6] sm:$0x3] %vm386_vm1, %v385_v23 }
  0xb3 PF: > { %s14_s17 = sadd.s32 1, %s604_s17   ;;  %s715_s15 = smov %s600_s16 }
  0xb4   : > { %p11_p5 = scmp.ge.s32.totalorder %s14_s17, 4   ;;  %s716_s16 = smov %s718_s18 }
  0xb6   :  { %13 = sbr.rel (!%p11_p5) target bundleno = 2 (0x2), region = 69 }

// kernel: siglip_vision_model.9
= control target key start
LH: loop header
LB: loop body
LE: loop exit
PB: predicated region body
PF: predicated region fallthrough
CT: control target
= control target key end

     0   :  { %vm26_vm0 = vcmask 261120   ;;  %v148_v3 = vmov 32.0   ;;  %vm104_vm5 = vcmask 257024   ;;  %s221_s0 = inlined_call_operand.vmem [shape: bf16[8,32], index: 0, kind: input, shape index: {}]   ;;  %s222_s1 = inlined_call_operand.vmem [shape: f32[1,32], index: 1, kind: input, shape index: {}]   ;;  %s223_s2 = inlined_call_operand.vmem [shape: f32[1,32], index: 2, kind: input, shape index: {}]   ;;  %s224_s4 = inlined_call_operand.vmem [shape: f32[1,96], index: 4, kind: input, shape index: {}]   ;;  %s225_s3 = inlined_call_operand.vmem [shape: bf16[32,96], index: 3, kind: input, shape index: {}]   ;;  %s226_s5 = inlined_call_operand.vmem [shape: bf16[8,32], index: 5, kind: output, shape index: {0}]   ;;  %s227_s6 = inlined_call_operand.vmem [shape: bf16[8,32], index: 6, kind: output, shape index: {1}]   ;;  %s228_s7 = inlined_call_operand.vmem [shape: bf16[8,32], index: 7, kind: output, shape index: {2}]  }
   0x1   :  { %v24_v0 = vld [vmem:[%s221_s0] sm:$0xf]  ;;  %144 = vrcp.f32 %v148_v3  ;;  %v137_v15 = vld [vmem:[%s225_s3 + $0x8] sm:$0xff] }
   0x2   :  { %v25_v1 = vunpack.c.l.bf16 %v24_v0  ;;  %96 = vmatpush.bf16.msra.mxu0 %v137_v15  ;;  %v136_v16 = vld [vmem:[%s225_s3] sm:$0xff] }
   0x3   :  { %v141_v26 = vld [vmem:[%s222_s1] ss:$0 sm:$0xff]  ;;  %s149_s1 = smov 96  }
   0x4   :  { %v27_v2 = vsel %vm26_vm0, %v25_v1, 0.0  ;;  %v142_v29 = vld [vmem:[%s223_s2] ss:$0 sm:$0xff]  ;;  %s150_s2 = smov 64  }
   0x5   :  { %28 = vadd.xlane.f32.xlu0 %v27_v2  ;;  %v143_v33 = vld [vmem:[%s224_s4] ss:$0 sm:$0xff] }
   0x6   :  { %97 = vmatpush.bf16.msra.mxu0 %v136_v16 }
   0x7   :  { %v145_v4 = vpop.eup %144 }
   0x8   :  { %v31_v5 = vmul.f32 32.0, %v145_v4  ;;  %vm35_vm1 = vweird.f32 %v145_v4 }
   0xa   :  { %v32_v6 = vsub.f32 1.0, %v31_v5 }
   0xc   :  { %v33_v7 = vmul.f32 %v145_v4, %v32_v6 }
   0xe   :  { %v34_v8 = vadd.f32 %v145_v4, %v33_v7 }
  0x10   :  { %v36_v9 = vsel %vm35_vm1, %v145_v4, %v34_v8 }
  0x78   :  { %v29_v10 = vpop.xlane.xlu0 %28 }
  0x79   :  { %v37_v11 = vmul.f32 %v36_v9, %v29_v10 }
  0x7b   :  { %v38_v12 = vsub.f32 %v25_v1, %v37_v11 }
  0x7d   :  { %v39_v13 = vmul.f32 %v38_v12, %v38_v12 }
  0x7f   :  { %v40_v14 = vsel %vm26_vm0, %v39_v13, 0.0 }
  0x80   :  { %41 = vadd.xlane.f32.xlu0 %v40_v14 }
  0xf3   :  { %v42_v17 = vpop.xlane.xlu0 %41 }
  0xf4   :  { %v43_v18 = vmul.f32 %v42_v17, %v36_v9 }
  0xf6   :  { %v44_v19 = vadd.f32 1e-06, %v43_v18 }
  0xf8   :  { %146 = vrsqrt.f32 %v44_v19  ;;  %vm51_vm3 = vweird.f32 %v44_v19 }
  0xfe   :  { %v147_v20 = vpop.eup %146 }
  0xff   :  { %v46_v21 = vmul.f32 %v147_v20, %v44_v19  ;;  %vm52_vm2 = vweird.f32 %v147_v20 }
 0x100   :  { %vm53_vm4 = vmor %vm51_vm3, %vm52_vm2 }
 0x101   :  { %v47_v22 = vmul.f32 %v147_v20, %v46_v21 }
 0x103   :  { %v48_v23 = vmul.f32 0.5, %v47_v22 }
 0x105   :  { %v49_v24 = vsub.f32 1.5, %v48_v23 }
 0x107   :  { %v50_v25 = vmul.f32 %v147_v20, %v49_v24 }
 0x109   :  { %v54_v27 = vsel %vm53_vm4, %v147_v20, %v50_v25 }
 0x10a   :  { %v55_v28 = vmul.f32 %v54_v27, %v38_v12 }
 0x10c   :  { %v60_v30 = vmul.f32 %v141_v26, %v55_v28 }
 0x10e   :  { %v65_v31 = vadd.f32 %v142_v29, %v60_v30 }
 0x110   :  { %v66_v32 = vpack.c.bf16 %v65_v31, %v65_v31 }
 0x112   :  { %135 = vmatmul.msk.bf16.vlgmr.msra.gmra.mxu0 %vm26_vm0, %v66_v32 }
 0x18f   :  { %v99_v34 = vpop.f32.mrf.mxu0 }
 0x190   :  { %v100_v35 = vadd.f32 %v143_v33, %v99_v34 }
 0x192   :  { %v103_v36 = vpack.c.bf16 %v100_v35, %v100_v35 }
 0x194   :  { %107 = vrot.lane.b32.xlu1 %v103_v36, %s149_s1  ;;  %105 = vst.msk [vmem:[%s226_s5] sm:$0xf] %vm104_vm5, %v103_v36 }
 0x197   :  { %v101_v37 = vpop.f32.mrf.mxu0 }
 0x19c   :  { %111 = vrot.lane.b32.xlu1 %v103_v36, %s150_s2 }
 0x206   :  { %v108_v38 = vpop.permute.xlu1 %107 }
 0x207   :  { %110 = vst.msk [vmem:[%s227_s6] sm:$0xf] %vm104_vm5, %v108_v38 }
 0x20e   :  { %v112_v39 = vpop.permute.xlu1 %111 }
 0x20f   :  { %114 = vst.msk [vmem:[%s228_s7] sm:$0xf] %vm104_vm5, %v112_v39 }

// kernel: siglip_vision_model.11
= control target key start
LH: loop header
LB: loop body
LE: loop exit
PB: predicated region body
PF: predicated region fallthrough
CT: control target
= control target key end

     0   :  { %vm33_vm0 = vcmask 261120   ;;  %v240_v3 = vmov 32.0   ;;  %vm74_vm5 = vcmask 257024   ;;  %v241_v38 = vmov 0.0   ;;  %s328_s0 = inlined_call_operand.vmem [shape: bf16[8,32], index: 0, kind: input, shape index: {}]   ;;  %s329_s1 = inlined_call_operand.vmem [shape: f32[1,32], index: 1, kind: input, shape index: {}]   ;;  %s330_s2 = inlined_call_operand.vmem [shape: f32[1,32], index: 2, kind: input, shape index: {}]   ;;  %s331_s4 = inlined_call_operand.vmem [shape: f32[1,64], index: 4, kind: input, shape index: {}]   ;;  %s332_s3 = inlined_call_operand.vmem [shape: bf16[32,64], index: 3, kind: input, shape index: {}]   ;;  %s333_s6 = inlined_call_operand.vmem [shape: f32[1,32], index: 6, kind: input, shape index: {}]   ;;  %s334_s5 = inlined_call_operand.vmem [shape: bf16[64,32], index: 5, kind: input, shape index: {}]   ;;  %s335_s7 = inlined_call_operand.vmem [shape: bf16[8,32], index: 7, kind: output, shape index: {}]  }
   0x1   :  { %v31_v0 = vld [vmem:[%s328_s0] sm:$0xf]  ;;  %234 = vrcp.f32 %v240_v3  ;;  %v223_v15 = vld [vmem:[%s332_s3 + $0x8] sm:$0xff]  ;;  %v227_v34 = vld [vmem:[%s334_s5 + $0x18] sm:$0xff]  ;;  %76 = vst.msk [vmem:[#allocation3] sm:$0xff] %vm33_vm0, %v241_v38  ;;  %vm158_vm6 = vcmask 523264  }
   0x2   :  { %v32_v1 = vunpack.c.l.bf16 %v31_v0  ;;  %108 = vmatpush.bf16.msra.mxu0 %v223_v15  ;;  %v222_v17 = vld [vmem:[%s332_s3] sm:$0xff]  ;;  %166 = vmatpush.bf16.msra.mxu1 %v227_v34  ;;  %v226_v35 = vld [vmem:[%s334_s5 + $0x10] sm:$0xff]  ;;  %v225_v36 = vld [vmem:[%s334_s5 + $0x8] sm:$0xff] }
   0x3   :  { %v230_v26 = vld [vmem:[%s329_s1] ss:$0 sm:$0xff] }
   0x4   :  { %v34_v2 = vsel %vm33_vm0, %v32_v1, 0.0  ;;  %v231_v28 = vld [vmem:[%s330_s2] ss:$0 sm:$0xff] }
   0x5   :  { %35 = vadd.xlane.f32.xlu0 %v34_v2  ;;  %v224_v37 = vld [vmem:[%s334_s5] sm:$0xff] }
   0x6   :  { %109 = vmatpush.bf16.msra.mxu0 %v222_v17  ;;  %167 = vmatpush.bf16.msra.mxu1 %v226_v35  ;;  %v232_v39 = vld [vmem:[%s331_s4] ss:$0 sm:$0xff] }
   0x7   :  { %v235_v4 = vpop.eup %234  ;;  %v180_v56 = vld [vmem:[%s328_s0] sm:$0xf] }
   0x8   :  { %v38_v5 = vmul.f32 32.0, %v235_v4  ;;  %vm42_vm1 = vweird.f32 %v235_v4  ;;  %v124_v53 = vld [vmem:[#allocation3] sm:$0xff]  ;;  %v181_v57 = vunpack.c.l.bf16 %v180_v56  ;;  %v233_v59 = vld [vmem:[%s333_s6] ss:$0 sm:$0xff] }
   0xa   :  { %v39_v6 = vsub.f32 1.0, %v38_v5  ;;  %168 = vmatpush.bf16.msra.mxu1 %v225_v36 }
   0xc   :  { %v40_v7 = vmul.f32 %v235_v4, %v39_v6 }
   0xe   :  { %v41_v8 = vadd.f32 %v235_v4, %v40_v7  ;;  %169 = vmatpush.bf16.msra.mxu1 %v224_v37 }
  0x10   :  { %v43_v9 = vsel %vm42_vm1, %v235_v4, %v41_v8 }
  0x78   :  { %v36_v10 = vpop.xlane.xlu0 %35 }
  0x79   :  { %v44_v11 = vmul.f32 %v43_v9, %v36_v10 }
  0x7b   :  { %v45_v12 = vsub.f32 %v32_v1, %v44_v11 }
  0x7d   :  { %v46_v13 = vmul.f32 %v45_v12, %v45_v12 }
  0x7f   :  { %v47_v14 = vsel %vm33_vm0, %v46_v13, 0.0 }
  0x80   :  { %48 = vadd.xlane.f32.xlu0 %v47_v14 }
  0xf3   :  { %v49_v16 = vpop.xlane.xlu0 %48 }
  0xf4   :  { %v50_v18 = vmul.f32 %v49_v16, %v43_v9 }
  0xf6   :  { %v51_v19 = vadd.f32 1e-06, %v50_v18 }
  0xf8   :  { %236 = vrsqrt.f32 %v51_v19  ;;  %vm58_vm3 = vweird.f32 %v51_v19 }
  0xfe   :  { %v237_v20 = vpop.eup %236 }
  0xff   :  { %v53_v21 = vmul.f32 %v237_v20, %v51_v19  ;;  %vm59_vm2 = vweird.f32 %v237_v20 }
 0x100   :  { %vm60_vm4 = vmor %vm58_vm3, %vm59_vm2 }
 0x101   :  { %v54_v22 = vmul.f32 %v237_v20, %v53_v21 }
 0x103   :  { %v55_v23 = vmul.f32 0.5, %v54_v22 }
 0x105   :  { %v56_v24 = vsub.f32 1.5, %v55_v23 }
 0x107   :  { %v57_v25 = vmul.f32 %v237_v20, %v56_v24 }
 0x109   :  { %v61_v27 = vsel %vm60_vm4, %v237_v20, %v57_v25 }
 0x10a   :  { %v62_v29 = vmul.f32 %v61_v27, %v45_v12 }
 0x10c   :  { %v67_v30 = vmul.f32 %v230_v26, %v62_v29 }
 0x10e   :  { %v72_v31 = vadd.f32 %v231_v28, %v67_v30 }
 0x110   :  { %v73_v32 = vpack.c.bf16 %v72_v31, %v72_v31 }
 0x112   :  { %75 = vst.msk [vmem:[#allocation2] sm:$0xf] %vm74_vm5, %v73_v32 }
 0x119   :  { %v77_v33 = vld [vmem:[#allocation2] sm:$0xf] }
 0x11a   :  { %204 = vmatmul.msk.bf16.vlgmr.msra.gmra.mxu0 %vm33_vm0, %v77_v33 }
 0x197   :  { %v111_v40 = vpop.f32.mrf.mxu0 }
 0x198   :  { %v112_v41 = vadd.f32 %v232_v39, %v111_v40 }
 0x19a   :  { %v116_v42 = vmul.f32 0.044715, %v112_v41  ;;  %v115_v49 = vmul.f32 0.5, %v112_v41 }
 0x19c   :  { %v117_v43 = vmul.f32 %v116_v42, %v112_v41 }
 0x19e   :  { %v118_v44 = vmul.f32 %v117_v43, %v112_v41 }
 0x19f   :  { %v113_v45 = vpop.f32.mrf.mxu0 }
 0x1a0   :  { %v119_v46 = vadd.f32 %v118_v44, %v112_v41 }
 0x1a2   :  { %v120_v47 = vmul.f32 0.7978846, %v119_v46 }
 0x1a4   :  { %238 = vtanh.f32 %v120_v47 }
 0x1aa   :  { %v239_v48 = vpop.eup %238 }
 0x1ab   :  { %v122_v50 = vadd.f32 1.0, %v239_v48 }
 0x1ad   :  { %v123_v51 = vmul.f32 %v122_v50, %v115_v49 }
 0x1af   :  { %v125_v52 = vpack.c.bf16 %v123_v51, %v123_v51 }
 0x1b1   :  { %221 = vmatmul.msk.bf16.vlgmr.msra.gmra.mxu1 %vm158_vm6, %v125_v52 }
 0x22e   :  { %v171_v54 = vpop.f32.mrf.mxu1 }
 0x22f   :  { %v175_v55 = vadd.f32 %v171_v54, %v124_v53 }
 0x231   :  { %176 = vst.msk [vmem:[#allocation3] sm:$0xff] %vm33_vm0, %v175_v55 }
 0x236   :  { %v173_v58 = vpop.f32.mrf.mxu1 }
 0x238   :  { %v182_v60 = vld [vmem:[#allocation3] sm:$0xff] }
 0x239   :  { %v183_v61 = vadd.f32 %v182_v60, %v181_v57 }
 0x23b   :  { %v188_v62 = vadd.f32 %v233_v59, %v183_v61 }
 0x23d   :  { %v189_v63 = vpack.c.bf16 %v188_v62, %v188_v62 }
 0x23f   :  { %191 = vst.msk [vmem:[%s335_s7] sm:$0xf] %vm74_vm5, %v189_v63 }

// kernel: siglip_vision_model.15
= control target key start
LH: loop header
LB: loop body
LE: loop exit
PB: predicated region body
PF: predicated region fallthrough
CT: control target
= control target key end

     0   :  { %vm17_vm0 = vcmask 261120   ;;  %s145_s0 = inlined_call_operand.vmem [shape: bf16[8,32], index: 0, kind: input, shape index: {}]   ;;  %s146_s1 = inlined_call_operand.vmem [shape: f32[1,32], index: 1, kind: input, shape index: {}]   ;;  %s147_s2 = inlined_call_operand.vmem [shape: f32[1,32], index: 2, kind: input, shape index: {}]   ;;  %s148_s3 = inlined_call_operand.hbm [shape: f32[8,32], index: 3, kind: output, shape index: {}]  }
   0x1   :  { %v15_v0 = vld [vmem:[%s145_s0] sm:$0xf] }
   0x2   :  { %8 = vsyncpa [#allocation3], 0  ;;  %v16_v1 = vunpack.c.l.bf16 %v15_v0  ;;  %v108_v3 = vmov 32.0   ;;  %v76_v24 = vld [vmem:[%s146_s1] ss:$0 sm:$0xff]  ;;  %s109_s17 = smov [#allocation2]  }
   0x3   :  { %78 = vrcp.f32 %v108_v3  ;;  %v77_v27 = vld [vmem:[%s147_s2] ss:$0 sm:$0xff]  ;;  %s63_s18 = sshll.u32 %s109_s17, 4  ;;  %s65_s21 = sshll.u32 %s148_s3, 4  ;;  %s64_s18 = int_to_ptr.vmem [resolvable:$true] %s63_s18  ;;  %s66_s21 = int_to_ptr.hbm [resolvable:$true] %s65_s21 }
   0x4   :  { %v18_v2 = vsel %vm17_vm0, %v16_v1, 0.0 }
   0x5   :  { %19 = vadd.xlane.f32.xlu0 %v18_v2 }
   0x9   :  { %v79_v4 = vpop.eup %78 }
   0xa   :  { %v22_v5 = vmul.f32 32.0, %v79_v4  ;;  %vm26_vm1 = vweird.f32 %v79_v4 }
   0xc   :  { %v23_v6 = vsub.f32 1.0, %v22_v5 }
   0xe   :  { %v24_v7 = vmul.f32 %v79_v4, %v23_v6 }
  0x10   :  { %v25_v8 = vadd.f32 %v79_v4, %v24_v7 }
  0x12   :  { %v27_v9 = vsel %vm26_vm1, %v79_v4, %v25_v8 }
  0x78   :  { %v20_v10 = vpop.xlane.xlu0 %19 }
  0x79   :  { %v28_v11 = vmul.f32 %v27_v9, %v20_v10 }
  0x7b   :  { %v29_v12 = vsub.f32 %v16_v1, %v28_v11 }
  0x7d   :  { %v30_v13 = vmul.f32 %v29_v12, %v29_v12 }
  0x7f   :  { %v31_v14 = vsel %vm17_vm0, %v30_v13, 0.0 }
  0x80   :  { %32 = vadd.xlane.f32.xlu0 %v31_v14 }
  0xf3   :  { %v33_v15 = vpop.xlane.xlu0 %32 }
  0xf4   :  { %v34_v16 = vmul.f32 %v33_v15, %v27_v9 }
  0xf6   :  { %v35_v17 = vadd.f32 1e-06, %v34_v16 }
  0xf8   :  { %80 = vrsqrt.f32 %v35_v17  ;;  %vm42_vm3 = vweird.f32 %v35_v17 }
  0xfe   :  { %v81_v18 = vpop.eup %80 }
  0xff   :  { %v37_v19 = vmul.f32 %v81_v18, %v35_v17  ;;  %vm43_vm2 = vweird.f32 %v81_v18 }
 0x100   :  { %vm44_vm4 = vmor %vm42_vm3, %vm43_vm2 }
 0x101   :  { %v38_v20 = vmul.f32 %v81_v18, %v37_v19 }
 0x103   :  { %v39_v21 = vmul.f32 0.5, %v38_v20 }
 0x105   :  { %v40_v22 = vsub.f32 1.5, %v39_v21 }
 0x107   :  { %v41_v23 = vmul.f32 %v81_v18, %v40_v22 }
 0x109   :  { %v45_v25 = vsel %vm44_vm4, %v81_v18, %v41_v23 }
 0x10a   :  { %v46_v26 = vmul.f32 %v45_v25, %v29_v12 }
 0x10c   :  { %v51_v28 = vmul.f32 %v76_v24, %v46_v26 }
 0x10e   :  { %v56_v29 = vadd.f32 %v77_v27, %v51_v28 }
 0x110   :  { %57 = vst.msk [vmem:[#allocation2] sm:$0xff] %vm17_vm0, %v56_v29 }
 0x111   :  { %68 = dma.vmem_to_hbm [thread:$0]  %s64_s18, 128, %s66_s21, [#allocation3]  }
 0x112   :  { %106 = dma.done.wait [#allocation3], 128  }
 0x113   :  { %107 = vsyncadd [#allocation3], 4294967168 }
 0x114   :  { %73 = vsyncpa [#allocation3], 1 }

// kernel: siglip_vision_model.10
= control target key start
LH: loop header
LB: loop body
LE: loop exit
PB: predicated region body
PF: predicated region fallthrough
CT: control target
= control target key end

     0   :  { %s1357_s21 = smov 0   ;;  %s1359_s22 = smov 0   ;;  %s1570_s0 = inlined_call_operand.vmem [shape: bf16[2,4,32], index: 0, kind: input, shape index: {}]   ;;  %s1571_s1 = inlined_call_operand.vmem [shape: bf16[2,4,32], index: 1, kind: input, shape index: {}]   ;;  %s1572_s2 = inlined_call_operand.vmem [shape: bf16[2,4,32], index: 2, kind: input, shape index: {}]   ;;  %s1573_s3 = inlined_call_operand.vmem [shape: bf16[32,32], index: 3, kind: input, shape index: {}]   ;;  %s1574_s4 = inlined_call_operand.vmem [shape: f32[1,32], index: 4, kind: input, shape index: {}]   ;;  %s1575_s5 = inlined_call_operand.vmem [shape: bf16[2,4,32], index: 5, kind: input, shape index: {}]   ;;  %s1576_s6 = inlined_call_operand.vmem [shape: bf16[2,4,32], index: 6, kind: output, shape index: {}]  }
   0x1   :  { %s1361_s23 = smov 0  }
   0x2 LB: > { %s35_s24 = sadd.s32 1, %s1305_s22  ;;  %p1197_p0 = scmp.ge.s32.totalorder %s1309_s23, 1  ;;  %s1309_s23 = sphi %s1361_s23, %s16_s23   ;;  %s1305_s22 = sphi %s1359_s22, %s1578_s22   ;;  %s1301_s21 = sphi %s1357_s21, %s1577_s21  }
   0x3   : > { %p37_p1 = scmp.ge.s32.totalorder %s35_s24, 2  ;;  %p279_p2 = scmp.lt.s32.totalorder %s1309_s23, 3 }
   0x5   : > { %s1580_s24 = smov (%p37_p1, %s35_s24), 0  ;;  %p280_p3 = pnand %p1197_p0, %p279_p2 }
   0x6   : > { %p334_p4 = scmp.lt.s32.totalorder (!%p280_p3), %s1301_s21, 1  ;;  %s1311_s8 = smov (!%p280_p3), 112  }
   0x7   : > { %283 = sbr.rel (%p280_p3) target bundleno = 1086 (0x43e), region = 44  ;;  %s1312_s9 = smov (!%p280_p3), 120  }
   0x8   : > { %s1313_s10 = smov (!%p280_p3), 104   ;;  %s1319_s14 = smov (!%p280_p3), 16  }
   0x9   : > { %s1320_s15 = smov (!%p280_p3), 24   ;;  %s1321_s16 = smov (!%p280_p3), 8  }
   0xc   : > { %s1582_s21 = smov (!%p334_p4, %s1301_s21), 1  ;;  %v1314_v2 = vmov 1934713408   ;;  %vm400_vm0 = vcmask 1047556   ;;  %vm464_vm1 = vcmask 58368   ;;  %vm616_vm2 = vcmask 64512  }
   0xd   : > { %s1375_s25 = sshll.u32 %s1582_s21, 1  ;;  %v403_v3 = vunpack.c.l.s4 %v1314_v2  ;;  %vm374_vm3 = vcmask 3072   ;;  %vm701_vm4 = vcmask 27648   ;;  %vm827_vm5 = vcmask 1041408  }
   0xe   : > { %s347_s28 = scalar_lea.vmem %s1571_s1, %s1375_s25  ;;  %s340_s7 = scalar_lea.vmem %s1570_s0, %s1375_s25  ;;  %vm823_vm6 = vcmask 31744   ;;  %vm383_vm7 = vcmask 60416   ;;  %vm1022_vm8 = vcmask 130048   ;;  %vm1024_vm9 = vcmask 195584  }
   0xf   : > { %v469_v0 = vld [vmem:[%s347_s28] sm:$0x3]  ;;  %v1389_v7 = vunpack.c.0.s8 %v403_v3  ;;  %s354_s13 = scalar_lea.vmem %s1572_s2, %s1375_s25  ;;  %vm1043_vm10 = vcmask 261120   ;;  %s361_s27 = scalar_lea.vmem %s1575_s5, %s1375_s25  ;;  %vm1069_vm11 = vcmask 254976  }
  0x10   : > { %v388_v1 = vld [vmem:[%s340_s7] sm:$0x3]  ;;  %474 = vrot.lane.b32.xlu1 %v469_v0, %s1311_s8 }
  0x11   : > { %393 = vrot.lane.b32.xlu0 %v388_v1, %s1311_s8  ;;  %390 = vrot.lane.b32.xlu2 %v388_v1, %s1312_s9  ;;  %v1401_v23 = vld [vmem:[%s354_s13] sm:$0x3] }
  0x18   : > { %477 = vrot.lane.b32.xlu1 %v469_v0, %s1313_s10 }
  0x19   : > { %396 = vrot.lane.b32.xlu0 %v388_v1, %s1313_s10  ;;  %471 = vrot.lane.b32.xlu2 %v469_v0, %s1312_s9 }
  0x20   : > { %549 = vrot.lane.b32.xlu1 %v1401_v23, %s1313_s10 }
  0x21   : > { %546 = vrot.lane.b32.xlu0 %v1401_v23, %s1311_s8  ;;  %543 = vrot.lane.b32.xlu2 %v1401_v23, %s1312_s9  ;;  %s368_s8 = scalar_lea.vmem %s1576_s6, %s1375_s25 }
  0x6b   : > { %v391_v4 = vpop.permute.xlu2 %390 }
  0x73   : > { %v472_v14 = vpop.permute.xlu2 %471 }
  0x82   : > { %v475_v5 = vpop.permute.xlu1 %474 }
  0x83   : > { %v394_v6 = vpop.permute.xlu0 %393  ;;  %v480_v8 = vrot.slane %v475_v5, 4 }
  0x84   : > { %v399_v9 = vrot.slane %v394_v6, 4 }
  0x85   : > { %v482_v11 = vsel %vm400_vm0, %v480_v8, %v469_v0 }
  0x86   : > { %v401_v10 = vsel %vm400_vm0, %v399_v9, %v388_v1  ;;  %v486_v13 = vperm.slane %v482_v11, %v1389_v7 }
  0x87   : > { %v405_v12 = vperm.slane %v401_v10, %v1389_v7 }
  0x88   : > { %v487_v20 = vrot.slane %v486_v13, 4  ;;  %v501_v46 = vshrl.u32 %v486_v13, 16 }
  0x89   : > { %v406_v17 = vrot.slane %v405_v12, 4  ;;  %v420_v30 = vshrl.u32 %v405_v12, 16 }
  0x8a   : > { %v478_v15 = vpop.permute.xlu1 %477  ;;  %v488_v29 = vsel %vm400_vm0, 0, %v487_v20 }
  0x8b   : > { %v397_v16 = vpop.permute.xlu0 %396  ;;  %v489_v18 = vrot.slane %v478_v15, 4  ;;  %v407_v26 = vsel %vm400_vm0, 0, %v406_v17  ;;  %v509_v39 = vshrl.u32 %v488_v29, 16 }
  0x8c   : > { %v408_v19 = vrot.slane %v397_v16, 4  ;;  %v428_v31 = vshrl.u32 %v407_v26, 16 }
  0x8d   : > { %v490_v22 = vsel %vm400_vm0, %v489_v18, %v472_v14 }
  0x8e   : > { %v409_v21 = vsel %vm400_vm0, %v408_v19, %v391_v4  ;;  %v494_v25 = vperm.slane %v490_v22, %v1389_v7 }
  0x8f   : > { %v413_v24 = vperm.slane %v409_v21, %v1389_v7 }
  0x90   : > { %v495_v28 = vrot.slane %v494_v25, 4  ;;  %v502_v40 = vshrl.u32 %v494_v25, 16  ;;  %v499_v44 = vpack.i.b16 %v494_v25, %v486_v13 }
  0x91   : > { %v414_v27 = vrot.slane %v413_v24, 4  ;;  %v421_v34 = vshrl.u32 %v413_v24, 16  ;;  %v418_v38 = vpack.i.b16 %v413_v24, %v405_v12 }
  0x92   : > { %v496_v33 = vsel %vm400_vm0, 0, %v495_v28  ;;  %v503_v53 = vpack.i.b16 %v502_v40, %v501_v46 }
  0x93   : > { %v415_v32 = vsel %vm400_vm0, 0, %v414_v27  ;;  %v507_v37 = vpack.i.b16 %v496_v33, %v488_v29  ;;  %v510_v41 = vshrl.u32 %v496_v33, 16  ;;  %v422_v48 = vpack.i.b16 %v421_v34, %v420_v30  ;;  %v550_v30 = vpop.permute.xlu1 %549  ;;  %v544_v34 = vpop.permute.xlu2 %543 }
  0x94   : > { %v426_v35 = vpack.i.b16 %v415_v32, %v407_v26  ;;  %v429_v36 = vshrl.u32 %v415_v32, 16  ;;  %v560_v32 = vrot.slane %v550_v30, 4 }
  0x95   : > { %v513_v45 = vrot.slane %v507_v37, 4  ;;  %v511_v47 = vpack.i.b16 %v510_v41, %v509_v39 }
  0x96   : > { %v430_v42 = vpack.i.b16 %v429_v36, %v428_v31  ;;  %v432_v43 = vrot.slane %v426_v35, 4  ;;  %v547_v31 = vpop.permute.xlu0 %546  ;;  %v1315_v35 = vmov -inf   ;;  %v561_v37 = vsel %vm400_vm0, %v560_v32, %v544_v34 }
  0x97   : > { %v514_v51 = vsel %vm400_vm0, %v513_v45, %v499_v44  ;;  %v521_v55 = vrot.slane %v511_v47, 4  ;;  %v552_v33 = vrot.slane %v547_v31, 4  ;;  %375 = vst.msk [vmem:[#allocation3] sm:$0xf] %vm374_vm3, %v1315_v35  ;;  %v565_v39 = vperm.slane %v561_v37, %v1389_v7 }
  0x98   : > { %v433_v49 = vsel %vm400_vm0, %v432_v43, %v418_v38  ;;  %v440_v50 = vrot.slane %v430_v42, 4  ;;  %v518_v54 = vperm.slane %v514_v51, %v1389_v7  ;;  %376 = vst.msk [vmem:[#allocation3 + $0x4] sm:$0xf] %vm374_vm3, %v1315_v35 }
  0x99   : > { %v437_v52 = vperm.slane %v433_v49, %v1389_v7  ;;  %v522_v59 = vsel %vm400_vm0, %v521_v55, %v503_v53  ;;  %v553_v36 = vsel %vm400_vm0, %v552_v33, %v1401_v23  ;;  %377 = vst.msk [vmem:[#allocation3 + $0x8] sm:$0xf] %vm374_vm3, %v1315_v35  ;;  %v566_v41 = vrot.slane %v565_v39, 4 }
  0x9a   : > { %v441_v56 = vsel %vm400_vm0, %v440_v50, %v422_v48  ;;  %v526_v61 = vperm.slane %v522_v59, %v1389_v7  ;;  %v519_v62 = vrot.slane %v518_v54, 4  ;;  %v532_v4 = vshrl.u32 %v518_v54, 16  ;;  %378 = vst.msk [vmem:[#allocation3 + $0xc] sm:$0xf] %vm374_vm3, %v1315_v35 }
  0x9b   : > { %v438_v57 = vrot.slane %v437_v52, 4  ;;  %v445_v58 = vperm.slane %v441_v56, %v1389_v7  ;;  %v452_v60 = vshrl.u32 %v437_v52, 16  ;;  %v557_v38 = vperm.slane %v553_v36, %v1389_v7 }
  0x9c   : > { %v531_v3 = vpack.i.b16 %v526_v61, %v518_v54  ;;  %v533_v5 = vshrl.u32 %v526_v61, 16  ;;  %v520_v6 = vsel %vm400_vm0, 0, %v519_v62  ;;  %v527_v11 = vrot.slane %v526_v61, 4 }
  0x9d   : > { %v439_v63 = vsel %vm400_vm0, 0, %v438_v57  ;;  %v446_v0 = vrot.slane %v445_v58, 4  ;;  %v450_v1 = vpack.i.b16 %v445_v58, %v437_v52  ;;  %v453_v2 = vshrl.u32 %v445_v58, 16 }
  0x9e   : > { %v460_v10 = vshrl.u32 %v439_v63, 16  ;;  %v621_v14 = vsel %vm616_vm2, %v531_v3, 0  ;;  %v534_v15 = vpack.i.b16 %v533_v5, %v532_v4  ;;  %v528_v16 = vsel %vm400_vm0, 0, %v527_v11 }
  0x9f   : > { %v447_v8 = vsel %vm400_vm0, 0, %v446_v0  ;;  %v454_v9 = vpack.i.b16 %v453_v2, %v452_v60  ;;  %465 = vst.msk [vmem:[#allocation2] sm:$0x3] %vm464_vm1, %v450_v1  ;;  %630 = vmatpush.bf16.xpose.msra.mxu0 %v621_v14  ;;  %v538_v17 = vshrl.u32 %v520_v6, 16  ;;  %v537_v20 = vpack.i.b16 %v528_v16, %v520_v6  ;;  %v698_v33 = vld [vmem:[#allocation3 + $0x4] sm:$0xf] }
  0xa0   : > { %v458_v12 = vpack.i.b16 %v447_v8, %v439_v63  ;;  %v461_v13 = vshrl.u32 %v447_v8, 16  ;;  %v640_v19 = vsel %vm616_vm2, %v534_v15, 0  ;;  %v539_v21 = vshrl.u32 %v528_v16, 16  ;;  %v699_v35 = vld [vmem:[#allocation3 + $0x8] sm:$0xf] }
  0xa1   : > { %466 = vst.msk [vmem:[#allocation2 + $0x2] sm:$0x3] %vm464_vm1, %v454_v9  ;;  %649 = vmatpush.bf16.xpose.msra.mxu1 %v640_v19  ;;  %v659_v22 = vsel %vm616_vm2, %v537_v20, 0  ;;  %v558_v40 = vrot.slane %v557_v38, 4  ;;  %v572_v42 = vshrl.u32 %v557_v38, 16  ;;  %v573_v43 = vshrl.u32 %v565_v39, 16 }
  0xa2   : > { %v462_v18 = vpack.i.b16 %v461_v13, %v460_v10  ;;  %467 = vst.msk [vmem:[#allocation2 + $0x4] sm:$0x3] %vm464_vm1, %v458_v12  ;;  %v540_v24 = vpack.i.b16 %v539_v21, %v538_v17  ;;  %668 = vmatpush.bf16.xpose.msra.mxu2 %v659_v22  ;;  %v567_v45 = vsel %vm400_vm0, 0, %v566_v41  ;;  %v570_v46 = vpack.i.b16 %v565_v39, %v557_v38  ;;  %v700_v38 = vld [vmem:[#allocation3 + $0xc] sm:$0xf] }
  0xa3   : > { %v559_v44 = vsel %vm400_vm0, 0, %v558_v40  ;;  %v581_v48 = vshrl.u32 %v567_v45, 16  ;;  %v574_v49 = vpack.i.b16 %v573_v43, %v572_v42 }
  0xa4   : > { %468 = vst.msk [vmem:[#allocation2 + $0x6] sm:$0x3] %vm464_vm1, %v462_v18  ;;  %v678_v25 = vsel %vm616_vm2, %v540_v24, 0  ;;  %v578_v23 = vpack.i.b16 %v567_v45, %v559_v44  ;;  %v580_v47 = vshrl.u32 %v559_v44, 16 }
  0xa5   : > { %687 = vmatpush.bf16.xpose.msra.mxu3 %v678_v25 }
  0xa6   : > { %v612_v26 = vld [vmem:[#allocation2] sm:$0x3]  ;;  %v582_v50 = vpack.i.b16 %v581_v48, %v580_v47  ;;  %v584_v51 = vrot.slane %v578_v23, 4 }
  0xa7   : > { %1203 = vmatmul.msk.bf16.vlgmr.msra.gmra.mxu0 %vm616_vm2, %v612_v26 }
  0xa8   : > { %v613_v27 = vld [vmem:[#allocation2 + $0x2] sm:$0x3]  ;;  %v585_v54 = vsel %vm400_vm0, %v584_v51, %v570_v46  ;;  %v592_v55 = vrot.slane %v582_v50, 4 }
  0xa9   : > { %v614_v28 = vld [vmem:[#allocation2 + $0x4] sm:$0x3]  ;;  %1204 = vmatmul.msk.bf16.vlgmr.msra.gmra.mxu1 %vm616_vm2, %v613_v27  ;;  %v589_v57 = vperm.slane %v585_v54, %v1389_v7  ;;  %v1316_v27 = vmov 0  }
  0xaa   : > { %1205 = vmatmul.msk.bf16.vlgmr.msra.gmra.mxu2 %vm616_vm2, %v614_v28  ;;  %v593_v59 = vsel %vm400_vm0, %v592_v55, %v574_v49  ;;  %1260 = vset.pattern.permute.xlu2 %v1316_v27  ;;  %v1317_v28 = vmov 0.0  }
  0xab   : > { %v615_v29 = vld [vmem:[#allocation2 + $0x6] sm:$0x3]  ;;  %v597_v60 = vperm.slane %v593_v59, %v1389_v7  ;;  %v603_v61 = vshrl.u32 %v589_v57, 16  ;;  %v590_v62 = vrot.slane %v589_v57, 4  ;;  %1259 = vset.pattern.permute.xlu0 %v1316_v27  ;;  %1261 = vset.pattern.permute.xlu1 %v1316_v27  ;;  %379 = vst.msk [vmem:[#allocation4] sm:$0xf] %vm374_vm3, %v1317_v28 }
  0xac   : > { %1206 = vmatmul.msk.bf16.vlgmr.msra.gmra.mxu3 %vm616_vm2, %v615_v29  ;;  %380 = vst.msk [vmem:[#allocation4 + $0x4] sm:$0xf] %vm374_vm3, %v1317_v28  ;;  %v1483_v29 = vld [vmem:[#allocation3] sm:$0xf] }
  0xad   : > { %v602_v63 = vpack.i.b16 %v597_v60, %v589_v57  ;;  %v604_v0 = vshrl.u32 %v597_v60, 16  ;;  %v591_v1 = vsel %vm400_vm0, 0, %v590_v62  ;;  %v598_v2 = vrot.slane %v597_v60, 4  ;;  %381 = vst.msk [vmem:[#allocation4 + $0x8] sm:$0xf] %vm374_vm3, %v1317_v28 }
  0xae   : > { %v609_v4 = vshrl.u32 %v591_v1, 16  ;;  %382 = vst.msk [vmem:[#allocation4 + $0xc] sm:$0xf] %vm374_vm3, %v1317_v28 }
  0xaf   : > { %v829_v6 = vsel %vm827_vm5, %v602_v63, 0  ;;  %v605_v8 = vpack.i.b16 %v604_v0, %v603_v61  ;;  %v599_v9 = vsel %vm400_vm0, 0, %v598_v2  ;;  %386 = vst.msk [vmem:[#allocation5 + $0x8] sm:$0xf] %vm383_vm7, %v1317_v28 }
  0xb0   : > { %838 = vmatpush.bf16.msrb.mxu0 %v829_v6  ;;  %v608_v10 = vpack.i.b16 %v599_v9, %v591_v1  ;;  %v610_v11 = vshrl.u32 %v599_v9, 16  ;;  %384 = vst.msk [vmem:[#allocation5] sm:$0xf] %vm383_vm7, %v1317_v28 }
  0xb1   : > { %v848_v14 = vsel %vm827_vm5, %v605_v8, 0  ;;  %385 = vst.msk [vmem:[#allocation5 + $0x4] sm:$0xf] %vm383_vm7, %v1317_v28 }
  0xb2   : > { %857 = vmatpush.bf16.msrb.mxu1 %v848_v14  ;;  %v867_v17 = vsel %vm827_vm5, %v608_v10, 0  ;;  %v611_v18 = vpack.i.b16 %v610_v11, %v609_v4  ;;  %387 = vst.msk [vmem:[#allocation5 + $0xc] sm:$0xf] %vm383_vm7, %v1317_v28 }
  0xb3   : > { %876 = vmatpush.bf16.msrb.mxu2 %v867_v17 }
  0xb4   : > { %v886_v22 = vsel %vm827_vm5, %v611_v18, 0 }
  0xb5   : > { %895 = vmatpush.bf16.msrb.mxu3 %v886_v22  ;;  %v765_v22 = vld [vmem:[#allocation4 + $0xc] sm:$0xf] }
 0x124   : > { %v632_v52 = vpop.f32.mrf.mxu0 }
 0x125   : > { %v1449_v53 = vmul.f32 0.35355338, %v632_v52 }
 0x126   : > { %v651_v56 = vpop.f32.mrf.mxu1 }
 0x127   : > { %v702_v58 = vsel %vm701_vm4, %v1449_v53, -inf  ;;  %v1458_v3 = vmul.f32 0.35355338, %v651_v56 }
 0x128   : > { %703 = vmax.xlane.f32.xlu2 %v702_v58 }
 0x129   : > { %v705_v16 = vsel %vm701_vm4, %v1458_v3, -inf }
 0x12c   : > { %v634_v5 = vpop.f32.mrf.mxu0 }
 0x12d   : > { %v670_v12 = vpop.f32.mrf.mxu2 }
 0x12e   : > { %v653_v13 = vpop.f32.mrf.mxu1  ;;  %v1463_v15 = vmul.f32 0.35355338, %v670_v12 }
 0x12f   : > { %v689_v19 = vpop.f32.mrf.mxu3  ;;  %v762_v13 = vld [vmem:[#allocation4] sm:$0xf] }
 0x130   : > { %706 = vmax.xlane.f32.xlu2 %v705_v16  ;;  %v1468_v20 = vmul.f32 0.35355338, %v689_v19  ;;  %v708_v21 = vsel %vm701_vm4, %v1463_v15, -inf }
 0x131   : > { %709 = vmax.xlane.f32.xlu0 %v708_v21  ;;  %v764_v21 = vld [vmem:[#allocation4 + $0x8] sm:$0xf] }
 0x132   : > { %v711_v24 = vsel %vm701_vm4, %v1468_v20, -inf }
 0x133   : > { %712 = vmax.xlane.f32.xlu1 %v711_v24 }
 0x135   : > { %v672_v25 = vpop.f32.mrf.mxu2 }
 0x137   : > { %v691_v26 = vpop.f32.mrf.mxu3 }
 0x19b   : > { %v704_v30 = vpop.xlane.xlu2 %703 }
 0x19c   : > { %v1486_v31 = vmax.f32 %v1483_v29, %v704_v30  ;;  %v763_v30 = vld [vmem:[#allocation4 + $0x4] sm:$0xf] }
 0x19e   : > { %v718_v32 = vsub.f32 %v1483_v29, %v1486_v31  ;;  %910 = vst.msk [vmem:[#allocation3] sm:$0xf] %vm374_vm3, %v1486_v31  ;;  %732 = vperm.xlu2 %1260, %v1486_v31  }
 0x1a0   : > { %v722_v9 = vmul.f32 1.442695, %v718_v32 }
 0x1a3   : > { %v707_v34 = vpop.xlane.xlu2 %706 }
 0x1a4   : > { %v715_v36 = vmax.f32 %v698_v33, %v707_v34  ;;  %v710_v37 = vpop.xlane.xlu0 %709 }
 0x1a5   : > { %v716_v40 = vmax.f32 %v699_v35, %v710_v37  ;;  %v793_v37 = vld [vmem:[#allocation5 + $0x8] sm:$0xf] }
 0x1a6   : > { %v719_v39 = vsub.f32 %v698_v33, %v715_v36  ;;  %911 = vst.msk [vmem:[#allocation3 + $0x4] sm:$0xf] %vm374_vm3, %v715_v36  ;;  %v713_v41 = vpop.xlane.xlu1 %712 }
 0x1a7   : > { %v720_v42 = vsub.f32 %v699_v35, %v716_v40  ;;  %912 = vst.msk [vmem:[#allocation3 + $0x8] sm:$0xf] %vm374_vm3, %v716_v40  ;;  %v717_v43 = vmax.f32 %v700_v38, %v713_v41  ;;  %742 = vperm.xlu0 %1259, %v716_v40   ;;  %v792_v40 = vld [vmem:[#allocation5 + $0x4] sm:$0xf] }
 0x1a8   : > { %v724_v51 = vmul.f32 1.442695, %v719_v39 }
 0x1a9   : > { %v721_v44 = vsub.f32 %v700_v38, %v717_v43  ;;  %913 = vst.msk [vmem:[#allocation3 + $0xc] sm:$0xf] %vm374_vm3, %v717_v43  ;;  %747 = vperm.xlu1 %1261, %v717_v43   ;;  %v726_v50 = vmul.f32 1.442695, %v720_v42 }
 0x1ab   : > { %v728_v10 = vmul.f32 1.442695, %v721_v44 }
 0x1b1   : > { %737 = vperm.xlu1 %1261, %v715_v36  }
 0x1f8   : > { %v733_v45 = vpop.permute.xlu2 %732 }
 0x1f9   : > { %v750_v46 = vsub.f32 %v1449_v53, %v733_v45 }
 0x1fb   : > { %v754_v23 = vmul.f32 1.442695, %v750_v46 }
 0x1fd   : > { %1263 = vpow2.f32 %v754_v23 }
 0x1fe   : > { %1265 = vpow2.f32 %v726_v50 }
 0x1ff   : > { %1267 = vpow2.f32 %v724_v51 }
 0x203   : > { %v1264_v47 = vpop.eup %1263 }
 0x204   : > { %v770_v48 = vsel %vm701_vm4, %v1264_v47, 0.0  ;;  %v819_v49 = vpack.c.bf16 %v1264_v47, %v1264_v47  ;;  %v1266_v55 = vpop.eup %1265 }
 0x205   : > { %771 = vadd.xlane.f32.xlu2 %v770_v48  ;;  %v1268_v59 = vpop.eup %1267  ;;  %v768_v24 = vmul.f32 %v1266_v55, %v764_v21 }
 0x206   : > { %1207 = vmatmul.msk.bf16.vlgmr.msrb.gmra.mxu0 %vm823_vm6, %v819_v49  ;;  %v767_v32 = vmul.f32 %v1268_v59, %v763_v30  ;;  %v791_v49 = vld [vmem:[#allocation5] sm:$0xf] }
 0x219   : > { %v743_v52 = vpop.permute.xlu0 %742 }
 0x21a   : > { %v752_v54 = vsub.f32 %v1463_v15, %v743_v52 }
 0x21b   : > { %v748_v56 = vpop.permute.xlu1 %747 }
 0x21c   : > { %v758_v57 = vmul.f32 1.442695, %v752_v54  ;;  %v753_v53 = vsub.f32 %v1468_v20, %v748_v56  ;;  %v794_v56 = vld [vmem:[#allocation5 + $0xc] sm:$0xf] }
 0x21d   : > { %807 = vperm.xlu2 %1260, %v1266_v55  }
 0x21e   : > { %1269 = vpow2.f32 %v758_v57  ;;  %v760_v58 = vmul.f32 1.442695, %v753_v53 }
 0x220   : > { %1271 = vpow2.f32 %v760_v58 }
 0x223   : > { %v738_v60 = vpop.permute.xlu1 %737 }
 0x224   : > { %v1270_v61 = vpop.eup %1269  ;;  %v751_v62 = vsub.f32 %v1458_v3, %v738_v60 }
 0x225   : > { %802 = vperm.xlu2 %1260, %v1268_v59   ;;  %v776_v63 = vsel %vm701_vm4, %v1270_v61, 0.0  ;;  %v821_v0 = vpack.c.bf16 %v1270_v61, %v1270_v61 }
 0x226   : > { %v1272_v1 = vpop.eup %1271  ;;  %v756_v2 = vmul.f32 1.442695, %v751_v62  ;;  %777 = vadd.xlane.f32.xlu0 %v776_v63 }
 0x227   : > { %1209 = vmatmul.msk.bf16.vlgmr.msrb.gmra.mxu2 %vm823_vm6, %v821_v0  ;;  %v779_v4 = vsel %vm701_vm4, %v1272_v1, 0.0  ;;  %v822_v5 = vpack.c.bf16 %v1272_v1, %v1272_v1  ;;  %v1318_v1 = vmov 1983009808  }
 0x228   : > { %1273 = vpow2.f32 %v756_v2  ;;  %780 = vadd.xlane.f32.xlu1 %v779_v4  ;;  %v957_v2 = vunpack.c.l.s4 %v1318_v1 }
 0x229   : > { %1210 = vmatmul.msk.bf16.vlgmr.msrb.gmra.mxu3 %vm823_vm6, %v822_v5  ;;  %1275 = vpow2.f32 %v722_v9 }
 0x22a   : > { %1277 = vpow2.f32 %v728_v10  ;;  %v958_v9 = vunpack.c.0.s8 %v957_v2 }
 0x22e   : > { %v1274_v6 = vpop.eup %1273 }
 0x22f   : > { %v773_v8 = vsel %vm701_vm4, %v1274_v6, 0.0  ;;  %v820_v3 = vpack.c.bf16 %v1274_v6, %v1274_v6  ;;  %v1276_v11 = vpop.eup %1275 }
 0x230   : > { %774 = vadd.xlane.f32.xlu0 %v773_v8  ;;  %v1278_v12 = vpop.eup %1277  ;;  %v766_v14 = vmul.f32 %v1276_v11, %v762_v13 }
 0x231   : > { %1208 = vmatmul.msk.bf16.vlgmr.msrb.gmra.mxu1 %vm823_vm6, %v820_v3  ;;  %v769_v27 = vmul.f32 %v1278_v12, %v765_v22 }
 0x241   : > { %797 = vperm.xlu1 %1261, %v1276_v11  }
 0x244   : > { %812 = vperm.xlu0 %1259, %v1278_v12  }
 0x278   : > { %v772_v15 = vpop.xlane.xlu2 %771 }
 0x279   : > { %v782_v16 = vadd.f32 %v772_v15, %v766_v14 }
 0x27b   : > { %787 = vst.msk [vmem:[#allocation4] sm:$0xf] %vm374_vm3, %v782_v16 }
 0x280   : > { %v808_v31 = vpop.permute.xlu2 %807 }
 0x281   : > { %v817_v38 = vmul.f32 %v808_v31, %v793_v37 }
 0x282   : > { %v921_v17 = vld [vmem:[#allocation4] sm:$0xf] }
 0x283   : > { %v840_v18 = vpop.f32.mrf.mxu0  ;;  %1279 = vrcp.f32 %v921_v17 }
 0x288   : > { %v803_v41 = vpop.permute.xlu2 %802 }
 0x289   : > { %v1280_v19 = vpop.eup %1279  ;;  %v816_v46 = vmul.f32 %v803_v41, %v792_v40 }
 0x28a   : > { %931 = vperm.xlu1 %1261, %v1280_v19  }
 0x28b   : > { %v842_v20 = vpop.f32.mrf.mxu0 }
 0x299   : > { %v778_v25 = vpop.xlane.xlu0 %777 }
 0x29a   : > { %v784_v26 = vadd.f32 %v778_v25, %v768_v24 }
 0x29b   : > { %v781_v29 = vpop.xlane.xlu1 %780 }
 0x29c   : > { %789 = vst.msk [vmem:[#allocation4 + $0x8] sm:$0xf] %vm374_vm3, %v784_v26  ;;  %v785_v28 = vadd.f32 %v781_v29, %v769_v27 }
 0x29e   : > { %790 = vst.msk [vmem:[#allocation4 + $0xc] sm:$0xf] %vm374_vm3, %v785_v28 }
 0x2a3   : > { %v775_v33 = vpop.xlane.xlu0 %774  ;;  %v923_v34 = vld [vmem:[#allocation4 + $0x8] sm:$0xf] }
 0x2a4   : > { %v783_v35 = vadd.f32 %v775_v33, %v767_v32  ;;  %1281 = vrcp.f32 %v923_v34 }
 0x2a5   : > { %v924_v36 = vld [vmem:[#allocation4 + $0xc] sm:$0xf] }
 0x2a6   : > { %788 = vst.msk [vmem:[#allocation4 + $0x4] sm:$0xf] %vm374_vm3, %v783_v35  ;;  %1283 = vrcp.f32 %v924_v36 }
 0x2aa   : > { %v1282_v39 = vpop.eup %1281  ;;  %v878_v42 = vpop.f32.mrf.mxu2 }
 0x2ab   : > { %v903_v43 = vadd.f32 %v878_v42, %v817_v38  ;;  %941 = vperm.xlu0 %1259, %v1282_v39  }
 0x2ac   : > { %v1284_v44 = vpop.eup %1283  ;;  %v897_v45 = vpop.f32.mrf.mxu3 }
 0x2ad   : > { %908 = vst.msk [vmem:[#allocation5 + $0x8] sm:$0xf] %vm383_vm7, %v903_v43  ;;  %946 = vperm.xlu2 %1260, %v1284_v44   ;;  %v922_v23 = vld [vmem:[#allocation4 + $0x4] sm:$0xf] }
 0x2ae   : > { %v859_v47 = vpop.f32.mrf.mxu1  ;;  %1285 = vrcp.f32 %v922_v23 }
 0x2af   : > { %v902_v48 = vadd.f32 %v859_v47, %v816_v46  ;;  %v1222_v46 = vld [vmem:[%s1573_s3] sm:$0xff] }
 0x2b1   : > { %907 = vst.msk [vmem:[#allocation5 + $0x4] sm:$0xf] %vm383_vm7, %v902_v48 }
 0x2b2   : > { %v880_v50 = vpop.f32.mrf.mxu2 }
 0x2b3   : > { %v798_v51 = vpop.permute.xlu1 %797 }
 0x2b4   : > { %v1286_v52 = vpop.eup %1285  ;;  %v815_v54 = vmul.f32 %v798_v51, %v791_v49  ;;  %v899_v55 = vpop.f32.mrf.mxu3  ;;  %v919_v61 = vld [vmem:[#allocation5 + $0x8] sm:$0xf] }
 0x2b5   : > { %936 = vperm.xlu0 %1259, %v1286_v52   ;;  %v1060_v52 = vld [vmem:[%s361_s27] sm:$0x3] }
 0x2b6   : > { %v901_v57 = vadd.f32 %v840_v18, %v815_v54  ;;  %v861_v53 = vpop.f32.mrf.mxu1  ;;  %v813_v58 = vpop.permute.xlu0 %812  ;;  %v1061_v54 = vunpack.c.l.bf16 %v1060_v52  ;;  %v1262_v55 = vld [vmem:[%s1574_s4] ss:$0 sm:$0xff] }
 0x2b7   : > { %v818_v59 = vmul.f32 %v813_v58, %v794_v56 }
 0x2b8   : > { %906 = vst.msk [vmem:[#allocation5] sm:$0xf] %vm383_vm7, %v901_v57  ;;  %v918_v13 = vld [vmem:[#allocation5 + $0x4] sm:$0xf] }
 0x2b9   : > { %v904_v60 = vadd.f32 %v897_v45, %v818_v59  ;;  %v1223_v45 = vld [vmem:[%s1573_s3 + $0x8] sm:$0xff] }
 0x2ba   : > { %1053 = vmatpush.bf16.msra.mxu0 %v1223_v45 }
 0x2bb   : > { %909 = vst.msk [vmem:[#allocation5 + $0xc] sm:$0xf] %vm383_vm7, %v904_v60 }
 0x2be   : > { %1054 = vmatpush.bf16.msra.mxu0 %v1222_v46 }
 0x2bf   : > { %v917_v5 = vld [vmem:[#allocation5] sm:$0xf] }
 0x2c2   : > { %v920_v3 = vld [vmem:[#allocation5 + $0xc] sm:$0xf] }
 0x2fc   : > { %v932_v0 = vpop.permute.xlu1 %931 }
 0x2fd   : > { %v949_v8 = vmul.f32 %v932_v0, %v917_v5 }
 0x307   : > { %v947_v6 = vpop.permute.xlu2 %946 }
 0x308   : > { %v952_v10 = vmul.f32 %v947_v6, %v920_v3 }
 0x30a   : > { %v960_v15 = vrot.slane %v952_v10, 4 }
 0x31d   : > { %v942_v62 = vpop.permute.xlu0 %941 }
 0x31e   : > { %v951_v63 = vmul.f32 %v942_v62, %v919_v61 }
 0x320   : > { %v953_v4 = vrot.slane %v951_v63, 4 }
 0x322   : > { %v955_v11 = vsel %vm400_vm0, %v953_v4, %v949_v8 }
 0x323   : > { %v959_v12 = vperm.slane %v955_v11, %v958_v9 }
 0x325   : > { %v968_v18 = vrot.slane %v959_v12, 4 }
 0x327   : > { %v937_v14 = vpop.permute.xlu0 %936 }
 0x328   : > { %v950_v16 = vmul.f32 %v937_v14, %v918_v13 }
 0x32a   : > { %v961_v17 = vsel %vm400_vm0, %v960_v15, %v950_v16 }
 0x32b   : > { %v965_v19 = vperm.slane %v961_v17, %v958_v9 }
 0x32d   : > { %v966_v20 = vrot.slane %v965_v19, 4  ;;  %v969_v21 = vsel %vm400_vm0, %v965_v19, %v968_v18 }
 0x32e   : > { %v977_v22 = vperm.slane %v969_v21, %v1389_v7 }
 0x32f   : > { %v967_v24 = vsel %vm400_vm0, %v966_v20, %v959_v12 }
 0x330   : > { %v973_v25 = vperm.slane %v967_v24, %v1389_v7  ;;  %v980_v26 = vrot.slane %v977_v22, 4 }
 0x332   : > { %v981_v27 = vsel %vm400_vm0, 0.0, %v980_v26  ;;  %v978_v29 = vrot.slane %v973_v25, 4  ;;  %v982_v28 = vsel %vm400_vm0, %v980_v26, %v973_v25 }
 0x333   : > { %v987_v30 = vrot.slane %v981_v27, 4  ;;  %v986_v31 = vperm.slane %v982_v28, %v958_v9 }
 0x334   : > { %v979_v32 = vsel %vm400_vm0, 0.0, %v978_v29 }
 0x335   : > { %v988_v33 = vsel %vm400_vm0, %v987_v30, %v979_v32  ;;  %v995_v34 = vrot.slane %v986_v31, 4 }
 0x336   : > { %v992_v35 = vperm.slane %v988_v33, %v958_v9 }
 0x338   : > { %v996_v36 = vsel %vm400_vm0, %v992_v35, %v995_v34  ;;  %v993_v37 = vrot.slane %v992_v35, 4 }
 0x339   : > { %v1004_v38 = vperm.slane %v996_v36, %v1389_v7 }
 0x33a   : > { %v994_v39 = vsel %vm400_vm0, %v993_v37, %v986_v31 }
 0x33b   : > { %1014 = vrot.lane.b32.xlu2 %v1004_v38, %s1319_s14  ;;  %v1007_v40 = vrot.slane %v1004_v38, 4  ;;  %v1000_v41 = vperm.slane %v994_v39, %v1389_v7 }
 0x33d   : > { %v1008_v42 = vsel %vm400_vm0, 0.0, %v1007_v40  ;;  %v1005_v43 = vrot.slane %v1000_v41, 4 }
 0x33e   : > { %1018 = vrot.lane.b32.xlu0 %v1008_v42, %s1320_s15 }
 0x33f   : > { %v1006_v44 = vsel %vm400_vm0, 0.0, %v1005_v43 }
 0x340   : > { %1010 = vrot.lane.b32.xlu1 %v1006_v44, %s1321_s16 }
 0x395   : > { %v1015_v23 = vpop.permute.xlu2 %1014 }
 0x3b0   : > { %v1019_v48 = vpop.permute.xlu0 %1018 }
 0x3b2   : > { %v1011_v7 = vpop.permute.xlu1 %1010 }
 0x3b3   : > { %v1021_v47 = vsel %vm616_vm2, %v1000_v41, %v1011_v7 }
 0x3b4   : > { %v1023_v49 = vsel %vm1022_vm8, %v1021_v47, %v1015_v23 }
 0x3b5   : > { %v1025_v50 = vsel %vm1024_vm9, %v1023_v49, %v1019_v48 }
 0x3b6   : > { %v1026_v51 = vpack.c.bf16 %v1025_v50, %v1025_v50 }
 0x3b8   : > { %1219 = vmatmul.msk.bf16.vlgmr.msra.gmra.mxu0 %vm1043_vm10, %v1026_v51 }
 0x435   : > { %v1056_v56 = vpop.f32.mrf.mxu0 }
 0x436   : > { %v1062_v57 = vadd.f32 %v1061_v54, %v1056_v56 }
 0x438   : > { %v1067_v53 = vadd.f32 %v1262_v55, %v1062_v57 }
 0x43a   : > { %v1068_v58 = vpack.c.bf16 %v1067_v53, %v1067_v53 }
 0x43c   : > { %1070 = vst.msk [vmem:[%s368_s8] sm:$0x3] %vm1069_vm11, %v1068_v58 }
 0x43d   : > { %v1058_v59 = vpop.f32.mrf.mxu0 }
 0x43e PF: > { %s16_s23 = sadd.s32 1, %s1309_s23   ;;  %s1577_s21 = smov %s1305_s22 }
 0x43f   : > { %p13_p5 = scmp.ge.s32.totalorder %s16_s23, 4   ;;  %s1578_s22 = smov %s1580_s24 }
 0x441   :  { %15 = sbr.rel (!%p13_p5) target bundleno = 2 (0x2), region = 91 }

</bundles_post_ra>
